<compile_context>
chip_gen: v7x
topology: tpu7x:2x2x1
jax: 0.10.0
libtpu: 0.0.40
codegen_flags: <defaults>
</compile_context>

<pallas_src>
import functools

import numpy as np
import jax
import jax.numpy as jnp
from jax.experimental import pallas as pl
from jax.experimental.pallas import tpu as pltpu

EPS = 1e-5                      # nn.InstanceNorm2d default eps
MXU_DTYPE = jnp.bfloat16        # matmul operand dtype (accumulation is f32)


# ---------------------------------------------------------------------------
# In-kernel helpers
# ---------------------------------------------------------------------------
def _roll_lanes(x, shift):
    """Static circular roll along the last (lane) axis: out[..., g] = x[..., g-shift]."""
    n = x.shape[-1]
    s = shift % n
    if s == 0:
        return x
    return jnp.concatenate([x[:, n - s:], x[:, :n - s]], axis=1)


def _reflect_cols(y, colmod, *, W, p):
    """Horizontal reflect-pad in the flat Wp-stride layout.

    y      : (C, H*Wp) with valid data at columns [0, W) of each Wp row-block.
    colmod : (1, H*Wp) int32, column index modulo Wp.
    returns: (C, H*Wp) whose row-blocks are [left-reflect p | valid W | right-reflect p].
    """
    v = _roll_lanes(y, p)                                   # interior columns
    for q in range(p):
        # left pad col q  <- valid col (p - q)
        v = jnp.where(colmod == q, _roll_lanes(y, -(p - 2 * q)), v)
        # right pad col (p + W + q) <- valid col (W - 2 - q)
        v = jnp.where(colmod == p + W + q, _roll_lanes(y, p + 2 + 2 * q), v)
    return v


def _instance_norm_affine(y, valid, inv_cnt, gamma, beta):
    """Per-channel InstanceNorm (biased variance over the `valid` columns) + affine.

    y: (C, Npos), valid: (1, Npos) bool, gamma/beta: (C, 1)."""
    ym = jnp.where(valid, y, 0.0)
    mean = jnp.sum(ym, axis=1, keepdims=True) * inv_cnt
    c = y - mean
    cm = jnp.where(valid, c, 0.0)
    var = jnp.sum(cm * cm, axis=1, keepdims=True) * inv_cnt
    return c * jax.lax.rsqrt(var + EPS) * gamma + beta


# ---------------------------------------------------------------------------
# Fused ResidualLayer kernel (one batch element per grid step)
# ---------------------------------------------------------------------------
def _residual_layer_kernel(xpad_ref, w1_ref, w2_ref, gb_ref, colmod_ref, o_ref,
                           y1pad_ref, slab1_ref, slab2_ref,
                           *, K, H, W, Cin, Cout):
    p = K // 2
    Wp = W + 2 * p
    Hp = H + 2 * p
    Npos = H * Wp                       # output columns (W valid + 2p junk per row)
    inv_cnt = 1.0 / float(H * W)

    colmod = colmod_ref[...]            # (1, Npos) int32: column index mod Wp
    valid = colmod < W                  # (1, Npos) bool : real (non-junk) columns

    # ---- ConvLayer 1: im2col (contiguous Wp-stride slices) -> one MXU matmul
    for kh in range(K):
        for kw in range(K):
            t = kh * K + kw
            off = kh * Wp + kw
            slab1_ref[t * Cin:(t + 1) * Cin, :] = (
                xpad_ref[0, :, off:off + Npos].astype(MXU_DTYPE))
    y1 = jnp.dot(w1_ref[...], slab1_ref[...],
                 preferred_element_type=jnp.float32)        # (Cout, Npos) f32
    # Conv bias omitted on purpose: it cancels against the IN mean subtraction.
    y1 = _instance_norm_affine(y1, valid, inv_cnt, gb_ref[:, 0:1], gb_ref[:, 1:2])
    y1 = jnp.maximum(y1, 0.0)

    # ---- reflect-pad y1 into the flat Wp-stride padded buffer -------------
    v = _reflect_cols(y1, colmod, W=W, p=p)                 # row i -> padded row i+p
    y1pad_ref[:, p * Wp:p * Wp + Npos] = v                  # interior, one big store
    for r in range(p):                                      # top reflect rows
        y1pad_ref[:, r * Wp:(r + 1) * Wp] = v[:, (p - r) * Wp:(p - r + 1) * Wp]
    for q in range(p):                                      # bottom reflect rows
        row = p + H + q
        y1pad_ref[:, row * Wp:(row + 1) * Wp] = \
            v[:, (H - 2 - q) * Wp:(H - 1 - q) * Wp]
    if p > 0:                                               # keep slop finite
        y1pad_ref[:, Hp * Wp:] = jnp.zeros((Cout, 2 * p), jnp.float32)

    # ---- ConvLayer 2: im2col -> matmul -> IN (linear activation) ----------
    for kh in range(K):
        for kw in range(K):
            t = kh * K + kw
            off = kh * Wp + kw
            slab2_ref[t * Cout:(t + 1) * Cout, :] = (
                y1pad_ref[:, off:off + Npos].astype(MXU_DTYPE))
    y2 = jnp.dot(w2_ref[...], slab2_ref[...],
                 preferred_element_type=jnp.float32)        # (Cout, Npos) f32
    y2 = _instance_norm_affine(y2, valid, inv_cnt, gb_ref[:, 2:3], gb_ref[:, 3:4])

    # ---- residual add + lane-dense store -----------------------------------
    # Original x in the same junk-column layout is just a contiguous slice of xpad.
    x_res = xpad_ref[0, :, p * Wp + p:p * Wp + p + Npos]    # (Cin, Npos)
    o_ref[0] = (y2 + x_res).astype(o_ref.dtype)


# ---------------------------------------------------------------------------
# Wrapper (NCHW in / NCHW out, matching the PyTorch module)
# ---------------------------------------------------------------------------
def residual_layer_forward(x_nchw, params, *, K):
    """ResidualLayer.forward: conv2(conv1(x)) + x."""
    N, C, H, W = x_nchw.shape
    Cout = params["w1"].shape[-1]
    p = K // 2
    assert K % 2 == 1 and H > p and W > p, "reflect pad needs odd K and H,W > K//2"
    assert C == Cout, "residual add requires in_ch == out_ch"
    # TODO(synk): stride > 1 not implemented (residual add requires stride=1).

    Hp, Wp = H + 2 * p, W + 2 * p
    Npos = H * Wp                   # per-row: W valid columns + 2p junk columns
    Lflat = Hp * Wp + 2 * p         # flat padded length (+2p slop for the last tap)

    x = x_nchw.astype(jnp.float32)
    xpad = jnp.pad(x, ((0, 0), (0, 0), (p, p), (p, p)), mode="reflect")
    xpad_flat = jnp.pad(xpad.reshape(N, C, Hp * Wp),
                        ((0, 0), (0, 0), (0, 2 * p)))        # (N, C, Lflat)

    # HWIO weights -> (Cout, K*K*Cin) with (kh, kw, cin) contraction order.
    w1 = jnp.transpose(params["w1"], (3, 0, 1, 2)).reshape(Cout, K * K * C)
    w2 = jnp.transpose(params["w2"], (3, 0, 1, 2)).reshape(Cout, K * K * Cout)
    w1 = w1.astype(MXU_DTYPE)
    w2 = w2.astype(MXU_DTYPE)
    # Both norms' gamma/beta stacked channel-major: columns [g1, bt1, g2, bt2].
    gbt = jnp.stack([params["g1"], params["bt1"],
                     params["g2"], params["bt2"]], axis=1).astype(jnp.float32)
    # Column index modulo Wp (precomputed -> no in-kernel integer division).
    colmod = (jnp.arange(Npos, dtype=jnp.int32) % Wp).reshape(1, Npos)

    kernel = functools.partial(_residual_layer_kernel,
                               K=K, H=H, W=W, Cin=C, Cout=Cout)

    flops = 2 * 2 * N * H * W * (K * K * C) * Cout          # two convs
    bytes_accessed = (xpad_flat.size + N * Cout * Npos) * 4 + (w1.size + w2.size) * 2

    out_flat = pl.pallas_call(
        kernel,
        out_shape=jax.ShapeDtypeStruct((N, Cout, Npos), jnp.float32),
        grid=(N,),
        in_specs=[
            pl.BlockSpec((1, C, Lflat), lambda n: (n, 0, 0)),
            pl.BlockSpec((Cout, K * K * C), lambda n: (0, 0)),
            pl.BlockSpec((Cout, K * K * Cout), lambda n: (0, 0)),
            pl.BlockSpec((Cout, 4), lambda n: (0, 0)),
            pl.BlockSpec((1, Npos), lambda n: (0, 0)),
        ],
        out_specs=pl.BlockSpec((1, Cout, Npos), lambda n: (n, 0, 0)),
        scratch_shapes=[
            pltpu.VMEM((Cout, Lflat), jnp.float32),          # reflect-padded y1 (flat)
            pltpu.VMEM((K * K * C, Npos), MXU_DTYPE),        # im2col slab, conv1 (bf16)
            pltpu.VMEM((K * K * Cout, Npos), MXU_DTYPE),     # im2col slab, conv2 (bf16)
        ],
        compiler_params=pltpu.CompilerParams(
            dimension_semantics=("parallel",)),
        cost_estimate=pl.CostEstimate(flops=flops,
                                      transcendentals=4 * N * Cout,
                                      bytes_accessed=bytes_accessed),
    )(xpad_flat, w1, w2, gbt, colmod)

    # (N, Cout, H*Wp) -> drop the 2p junk columns per row -> NCHW, no transpose.
    return out_flat.reshape(N, Cout, H, Wp)[:, :, :, :W]


# ---------------------------------------------------------------------------
# Pure-JAX reference (same bf16 MXU operands, f32 everywhere else)
# ---------------------------------------------------------------------------
def _ref_conv_layer(x_nhwc, w_hwio, b, g, bt, K, relu):
    p = K // 2
    xp = jnp.pad(x_nhwc, ((0, 0), (p, p), (p, p), (0, 0)), mode="reflect")
    y = jax.lax.conv_general_dilated(
        xp.astype(MXU_DTYPE), w_hwio.astype(MXU_DTYPE),
        window_strides=(1, 1), padding="VALID",
        dimension_numbers=("NHWC", "HWIO", "NHWC"),
        preferred_element_type=jnp.float32) + b
    mean = y.mean(axis=(1, 2), keepdims=True)
    var = y.var(axis=(1, 2), keepdims=True)          # biased, like InstanceNorm2d
    y = (y - mean) * jax.lax.rsqrt(var + EPS) * g + bt
    return jnp.maximum(y, 0.0) if relu else y


def _ref_residual_layer(x_nchw, params, K):
    x = jnp.transpose(x_nchw, (0, 2, 3, 1)).astype(jnp.float32)
    y1 = _ref_conv_layer(x, params["w1"], params["b1"], params["g1"],
                         params["bt1"], K, True)
    y2 = _ref_conv_layer(y1, params["w2"], params["b2"], params["g2"],
                         params["bt2"], K, False) + x
    return jnp.transpose(y2, (0, 3, 1, 2))


# ---------------------------------------------------------------------------
# Main
# ---------------------------------------------------------------------------
if __name__ == "__main__":
    N, C, H, W, K = 2, 4, 16, 16, 3          # ResidualLayer(C, C, K, stride=1)

    key = jax.random.PRNGKey(0)
    ks = jax.random.split(key, 9)
    x = jax.random.normal(ks[0], (N, C, H, W), jnp.float32)

    params = {
        # conv weights stored in HWIO (K, K, Cin, Cout)
        "w1": jax.random.normal(ks[1], (K, K, C, C), jnp.float32) * 0.1,
        "b1": jax.random.normal(ks[2], (C,), jnp.float32) * 0.1,   # used by ref only
        "g1": 1.0 + jax.random.normal(ks[3], (C,), jnp.float32) * 0.1,
        "bt1": jax.random.normal(ks[4], (C,), jnp.float32) * 0.1,
        "w2": jax.random.normal(ks[5], (K, K, C, C), jnp.float32) * 0.1,
        "b2": jax.random.normal(ks[6], (C,), jnp.float32) * 0.1,   # used by ref only
        "g2": 1.0 + jax.random.normal(ks[7], (C,), jnp.float32) * 0.1,
        "bt2": jax.random.normal(ks[8], (C,), jnp.float32) * 0.1,
    }

    out = jax.block_until_ready(residual_layer_forward(x, params, K=K))
    ref = jax.block_until_ready(_ref_residual_layer(x, params, K))

    assert out.shape == (N, C, H, W)
    # bf16 MXU operands in both paths; accumulation and all norm math in f32.
    assert np.allclose(np.asarray(out), np.asarray(ref), atol=1e-2, rtol=1e-2), \
        "Pallas result does not match reference"

    print("KERNEL_OK")
</pallas_src>

<mosaic_0001>
module attributes {stable_mosaic.version = 11 : i64} {
  func.func @_residual_layer_kernel(%arg0: i32, %arg1: memref<1x4x326xf32, #tpu.memory_space<vmem>>, %arg2: memref<4x36xbf16, #tpu.memory_space<vmem>>, %arg3: memref<4x36xbf16, #tpu.memory_space<vmem>>, %arg4: memref<4x4xf32, #tpu.memory_space<vmem>>, %arg5: memref<1x288xi32, #tpu.memory_space<vmem>>, %arg6: memref<1x4x288xf32, #tpu.memory_space<vmem>>, %arg7: memref<4x326xf32, #tpu.memory_space<vmem>>, %arg8: memref<36x288xbf16, #tpu.memory_space<vmem>>, %arg9: memref<36x288xbf16, #tpu.memory_space<vmem>>) attributes {dimension_semantics = [#tpu.dimension_semantics<parallel>], iteration_bounds = array<i64: 2>, scalar_prefetch = 0 : i64, scratch_operands = 3 : i64, tpu.core_type = #tpu.core_type<tc>, window_params = [{transform_indices = @transform_0, window_bounds = array<i64: 1, 4, 326>}, {pipeline_mode = #tpu.pipeline_mode<synchronous>, transform_indices = @transform_1, window_bounds = array<i64: 4, 36>}, {pipeline_mode = #tpu.pipeline_mode<synchronous>, transform_indices = @transform_2, window_bounds = array<i64: 4, 36>}, {pipeline_mode = #tpu.pipeline_mode<synchronous>, transform_indices = @transform_3, window_bounds = array<i64: 4, 4>}, {pipeline_mode = #tpu.pipeline_mode<synchronous>, transform_indices = @transform_4, window_bounds = array<i64: 1, 288>}, {transform_indices = @transform_5, window_bounds = array<i64: 1, 4, 288>}]} {
    %c0 = arith.constant 0 : index
    %c0_0 = arith.constant 0 : index
    %0 = vector.load %arg5[%c0, %c0_0] : memref<1x288xi32, #tpu.memory_space<vmem>>, vector<1x288xi32>
    %c16_i32 = arith.constant 16 : i32
    %1 = vector.broadcast %c16_i32 : i32 to vector<1x288xi32>
    %2 = arith.cmpi slt, %0, %1 : vector<1x288xi32>
    %c0_1 = arith.constant 0 : index
    %c0_2 = arith.constant 0 : index
    %c0_3 = arith.constant 0 : index
    %3 = vector.load %arg1[%c0_1, %c0_2, %c0_3] : memref<1x4x326xf32, #tpu.memory_space<vmem>>, vector<1x4x288xf32>
    %4 = vector.shape_cast %3 : vector<1x4x288xf32> to vector<4x288xf32>
    %5 = arith.truncf %4 : vector<4x288xf32> to vector<4x288xbf16>
    %c0_4 = arith.constant 0 : index
    %c0_5 = arith.constant 0 : index
    %6 = vector.load %arg8[%c0_4, %c0_5] : memref<36x288xbf16, #tpu.memory_space<vmem>>, vector<4x288xbf16>
    tpu.vector_store %arg8[%c0_4, %c0_5], %5 {strides = array<i32>} : memref<36x288xbf16, #tpu.memory_space<vmem>>, vector<4x288xbf16>,
    %c0_6 = arith.constant 0 : index
    %c0_7 = arith.constant 0 : index
    %c1 = arith.constant 1 : index
    %7 = vector.load %arg1[%c0_6, %c0_7, %c1] : memref<1x4x326xf32, #tpu.memory_space<vmem>>, vector<1x4x288xf32>
    %8 = vector.shape_cast %7 : vector<1x4x288xf32> to vector<4x288xf32>
    %9 = arith.truncf %8 : vector<4x288xf32> to vector<4x288xbf16>
    %c4 = arith.constant 4 : index
    %c0_8 = arith.constant 0 : index
    %10 = vector.load %arg8[%c4, %c0_8] : memref<36x288xbf16, #tpu.memory_space<vmem>>, vector<4x288xbf16>
    tpu.vector_store %arg8[%c4, %c0_8], %9 {strides = array<i32>} : memref<36x288xbf16, #tpu.memory_space<vmem>>, vector<4x288xbf16>,
    %c0_9 = arith.constant 0 : index
    %c0_10 = arith.constant 0 : index
    %c2 = arith.constant 2 : index
    %11 = vector.load %arg1[%c0_9, %c0_10, %c2] : memref<1x4x326xf32, #tpu.memory_space<vmem>>, vector<1x4x288xf32>
    %12 = vector.shape_cast %11 : vector<1x4x288xf32> to vector<4x288xf32>
    %13 = arith.truncf %12 : vector<4x288xf32> to vector<4x288xbf16>
    %c8 = arith.constant 8 : index
    %c0_11 = arith.constant 0 : index
    %14 = vector.load %arg8[%c8, %c0_11] : memref<36x288xbf16, #tpu.memory_space<vmem>>, vector<4x288xbf16>
    tpu.vector_store %arg8[%c8, %c0_11], %13 {strides = array<i32>} : memref<36x288xbf16, #tpu.memory_space<vmem>>, vector<4x288xbf16>,
    %c0_12 = arith.constant 0 : index
    %c0_13 = arith.constant 0 : index
    %c18 = arith.constant 18 : index
    %15 = vector.load %arg1[%c0_12, %c0_13, %c18] : memref<1x4x326xf32, #tpu.memory_space<vmem>>, vector<1x4x288xf32>
    %16 = vector.shape_cast %15 : vector<1x4x288xf32> to vector<4x288xf32>
    %17 = arith.truncf %16 : vector<4x288xf32> to vector<4x288xbf16>
    %c12 = arith.constant 12 : index
    %c0_14 = arith.constant 0 : index
    %18 = vector.load %arg8[%c12, %c0_14] : memref<36x288xbf16, #tpu.memory_space<vmem>>, vector<4x288xbf16>
    tpu.vector_store %arg8[%c12, %c0_14], %17 {strides = array<i32>} : memref<36x288xbf16, #tpu.memory_space<vmem>>, vector<4x288xbf16>,
    %c0_15 = arith.constant 0 : index
    %c0_16 = arith.constant 0 : index
    %c19 = arith.constant 19 : index
    %19 = vector.load %arg1[%c0_15, %c0_16, %c19] : memref<1x4x326xf32, #tpu.memory_space<vmem>>, vector<1x4x288xf32>
    %20 = vector.shape_cast %19 : vector<1x4x288xf32> to vector<4x288xf32>
    %21 = arith.truncf %20 : vector<4x288xf32> to vector<4x288xbf16>
    %c16 = arith.constant 16 : index
    %c0_17 = arith.constant 0 : index
    %22 = vector.load %arg8[%c16, %c0_17] : memref<36x288xbf16, #tpu.memory_space<vmem>>, vector<4x288xbf16>
    tpu.vector_store %arg8[%c16, %c0_17], %21 {strides = array<i32>} : memref<36x288xbf16, #tpu.memory_space<vmem>>, vector<4x288xbf16>,
    %c0_18 = arith.constant 0 : index
    %c0_19 = arith.constant 0 : index
    %c20 = arith.constant 20 : index
    %23 = vector.load %arg1[%c0_18, %c0_19, %c20] : memref<1x4x326xf32, #tpu.memory_space<vmem>>, vector<1x4x288xf32>
    %24 = vector.shape_cast %23 : vector<1x4x288xf32> to vector<4x288xf32>
    %25 = arith.truncf %24 : vector<4x288xf32> to vector<4x288xbf16>
    %c20_20 = arith.constant 20 : index
    %c0_21 = arith.constant 0 : index
    %26 = vector.load %arg8[%c20_20, %c0_21] : memref<36x288xbf16, #tpu.memory_space<vmem>>, vector<4x288xbf16>
    tpu.vector_store %arg8[%c20_20, %c0_21], %25 {strides = array<i32>} : memref<36x288xbf16, #tpu.memory_space<vmem>>, vector<4x288xbf16>,
    %c0_22 = arith.constant 0 : index
    %c0_23 = arith.constant 0 : index
    %c36 = arith.constant 36 : index
    %27 = vector.load %arg1[%c0_22, %c0_23, %c36] : memref<1x4x326xf32, #tpu.memory_space<vmem>>, vector<1x4x288xf32>
    %28 = vector.shape_cast %27 : vector<1x4x288xf32> to vector<4x288xf32>
    %29 = arith.truncf %28 : vector<4x288xf32> to vector<4x288xbf16>
    %c24 = arith.constant 24 : index
    %c0_24 = arith.constant 0 : index
    %30 = vector.load %arg8[%c24, %c0_24] : memref<36x288xbf16, #tpu.memory_space<vmem>>, vector<4x288xbf16>
    tpu.vector_store %arg8[%c24, %c0_24], %29 {strides = array<i32>} : memref<36x288xbf16, #tpu.memory_space<vmem>>, vector<4x288xbf16>,
    %c0_25 = arith.constant 0 : index
    %c0_26 = arith.constant 0 : index
    %c37 = arith.constant 37 : index
    %31 = vector.load %arg1[%c0_25, %c0_26, %c37] : memref<1x4x326xf32, #tpu.memory_space<vmem>>, vector<1x4x288xf32>
    %32 = vector.shape_cast %31 : vector<1x4x288xf32> to vector<4x288xf32>
    %33 = arith.truncf %32 : vector<4x288xf32> to vector<4x288xbf16>
    %c28 = arith.constant 28 : index
    %c0_27 = arith.constant 0 : index
    %34 = vector.load %arg8[%c28, %c0_27] : memref<36x288xbf16, #tpu.memory_space<vmem>>, vector<4x288xbf16>
    tpu.vector_store %arg8[%c28, %c0_27], %33 {strides = array<i32>} : memref<36x288xbf16, #tpu.memory_space<vmem>>, vector<4x288xbf16>,
    %c0_28 = arith.constant 0 : index
    %c0_29 = arith.constant 0 : index
    %c38 = arith.constant 38 : index
    %35 = vector.load %arg1[%c0_28, %c0_29, %c38] : memref<1x4x326xf32, #tpu.memory_space<vmem>>, vector<1x4x288xf32>
    %36 = vector.shape_cast %35 : vector<1x4x288xf32> to vector<4x288xf32>
    %37 = arith.truncf %36 : vector<4x288xf32> to vector<4x288xbf16>
    %c32 = arith.constant 32 : index
    %c0_30 = arith.constant 0 : index
    %38 = vector.load %arg8[%c32, %c0_30] : memref<36x288xbf16, #tpu.memory_space<vmem>>, vector<4x288xbf16>
    tpu.vector_store %arg8[%c32, %c0_30], %37 {strides = array<i32>} : memref<36x288xbf16, #tpu.memory_space<vmem>>, vector<4x288xbf16>,
    %c0_31 = arith.constant 0 : index
    %c0_32 = arith.constant 0 : index
    %39 = vector.load %arg2[%c0_31, %c0_32] : memref<4x36xbf16, #tpu.memory_space<vmem>>, vector<4x36xbf16>
    %c0_33 = arith.constant 0 : index
    %c0_34 = arith.constant 0 : index
    %40 = vector.load %arg8[%c0_33, %c0_34] : memref<36x288xbf16, #tpu.memory_space<vmem>>, vector<36x288xbf16>
    %cst = arith.constant dense<0.000000e+00> : vector<4x288xf32>
    %41 = tpu.matmul %39, %40, %cst {dimension_numbers = #tpu.dot_dimension_numbers<[1], [0], [0], [1], [0, 0, 1, 1], [], []>} : vector<4x36xbf16>, vector<36x288xbf16>, vector<4x288xf32> -> vector<4x288xf32>
    %c0_35 = arith.constant 0 : index
    %c0_36 = arith.constant 0 : index
    %42 = vector.load %arg4[%c0_35, %c0_36] : memref<4x4xf32, #tpu.memory_space<vmem>>, vector<4x1xf32>
    %c0_37 = arith.constant 0 : index
    %c1_38 = arith.constant 1 : index
    %43 = vector.load %arg4[%c0_37, %c1_38] : memref<4x4xf32, #tpu.memory_space<vmem>>, vector<4x1xf32>
    %cst_39 = arith.constant 0.000000e+00 : f32
    %44 = vector.shape_cast %2 : vector<1x288xi1> to vector<1x288xi1>
    %45 = vector.broadcast %44 : vector<1x288xi1> to vector<4x288xi1>
    %46 = vector.broadcast %cst_39 : f32 to vector<4x288xf32>
    %47 = arith.select %45, %41, %46 : vector<4x288xi1>, vector<4x288xf32>
    %cst_40 = arith.constant dense<0.000000e+00> : vector<4xf32>
    %48 = vector.multi_reduction <add>, %47, %cst_40 [1] : vector<4x288xf32> to vector<4xf32>
    %49 = vector.shape_cast %48 : vector<4xf32> to vector<4x1xf32>
    %cst_41 = arith.constant 3.906250e-03 : f32
    %50 = vector.broadcast %cst_41 : f32 to vector<4x1xf32>
    %51 = arith.mulf %49, %50 : vector<4x1xf32>
    %52 = vector.broadcast %51 : vector<4x1xf32> to vector<4x288xf32>
    %53 = arith.subf %41, %52 : vector<4x288xf32>
    %cst_42 = arith.constant 0.000000e+00 : f32
    %54 = vector.shape_cast %2 : vector<1x288xi1> to vector<1x288xi1>
    %55 = vector.broadcast %54 : vector<1x288xi1> to vector<4x288xi1>
    %56 = vector.broadcast %cst_42 : f32 to vector<4x288xf32>
    %57 = arith.select %55, %53, %56 : vector<4x288xi1>, vector<4x288xf32>
    %58 = arith.mulf %57, %57 : vector<4x288xf32>
    %cst_43 = arith.constant dense<0.000000e+00> : vector<4xf32>
    %59 = vector.multi_reduction <add>, %58, %cst_43 [1] : vector<4x288xf32> to vector<4xf32>
    %60 = vector.shape_cast %59 : vector<4xf32> to vector<4x1xf32>
    %cst_44 = arith.constant 3.906250e-03 : f32
    %61 = vector.broadcast %cst_44 : f32 to vector<4x1xf32>
    %62 = arith.mulf %60, %61 : vector<4x1xf32>
    %cst_45 = arith.constant 9.99999974E-6 : f32
    %63 = vector.broadcast %cst_45 : f32 to vector<4x1xf32>
    %64 = arith.addf %62, %63 : vector<4x1xf32>
    %65 = math.rsqrt %64 : vector<4x1xf32>
    %66 = vector.broadcast %65 : vector<4x1xf32> to vector<4x288xf32>
    %67 = arith.mulf %53, %66 : vector<4x288xf32>
    %68 = vector.broadcast %42 : vector<4x1xf32> to vector<4x288xf32>
    %69 = arith.mulf %67, %68 : vector<4x288xf32>
    %70 = vector.broadcast %43 : vector<4x1xf32> to vector<4x288xf32>
    %71 = arith.addf %69, %70 : vector<4x288xf32>
    %cst_46 = arith.constant 0.000000e+00 : f32
    %72 = vector.broadcast %cst_46 : f32 to vector<4x288xf32>
    %73 = arith.maximumf %71, %72 : vector<4x288xf32>
    %74 = vector.extract_strided_slice %73 {offsets = [0, 287], sizes = [4, 1], strides = [1, 1]} : vector<4x288xf32> to vector<4x1xf32>
    %75 = vector.extract_strided_slice %73 {offsets = [0, 0], sizes = [4, 287], strides = [1, 1]} : vector<4x288xf32> to vector<4x287xf32>
    %76 = tpu.concatenate %74, %75 in 1 : vector<4x1xf32>, vector<4x287xf32> -> vector<4x288xf32>
    %c0_i32 = arith.constant 0 : i32
    %77 = vector.broadcast %c0_i32 : i32 to vector<1x288xi32>
    %78 = arith.cmpi eq, %0, %77 : vector<1x288xi32>
    %79 = vector.extract_strided_slice %73 {offsets = [0, 1], sizes = [4, 287], strides = [1, 1]} : vector<4x288xf32> to vector<4x287xf32>
    %80 = vector.extract_strided_slice %73 {offsets = [0, 0], sizes = [4, 1], strides = [1, 1]} : vector<4x288xf32> to vector<4x1xf32>
    %81 = tpu.concatenate %79, %80 in 1 : vector<4x287xf32>, vector<4x1xf32> -> vector<4x288xf32>
    %82 = vector.shape_cast %78 : vector<1x288xi1> to vector<1x288xi1>
    %83 = vector.broadcast %82 : vector<1x288xi1> to vector<4x288xi1>
    %84 = arith.select %83, %81, %76 : vector<4x288xi1>, vector<4x288xf32>
    %c17_i32 = arith.constant 17 : i32
    %85 = vector.broadcast %c17_i32 : i32 to vector<1x288xi32>
    %86 = arith.cmpi eq, %0, %85 : vector<1x288xi32>
    %87 = vector.extract_strided_slice %73 {offsets = [0, 285], sizes = [4, 3], strides = [1, 1]} : vector<4x288xf32> to vector<4x3xf32>
    %88 = vector.extract_strided_slice %73 {offsets = [0, 0], sizes = [4, 285], strides = [1, 1]} : vector<4x288xf32> to vector<4x285xf32>
    %89 = tpu.concatenate %87, %88 in 1 : vector<4x3xf32>, vector<4x285xf32> -> vector<4x288xf32>
    %90 = vector.shape_cast %86 : vector<1x288xi1> to vector<1x288xi1>
    %91 = vector.broadcast %90 : vector<1x288xi1> to vector<4x288xi1>
    %92 = arith.select %91, %89, %84 : vector<4x288xi1>, vector<4x288xf32>
    %c0_47 = arith.constant 0 : index
    %c18_48 = arith.constant 18 : index
    %93 = vector.load %arg7[%c0_47, %c18_48] : memref<4x326xf32, #tpu.memory_space<vmem>>, vector<4x288xf32>
    tpu.vector_store %arg7[%c0_47, %c18_48], %92 {strides = array<i32>} : memref<4x326xf32, #tpu.memory_space<vmem>>, vector<4x288xf32>,
    %94 = vector.extract_strided_slice %92 {offsets = [0, 18], sizes = [4, 18], strides = [1, 1]} : vector<4x288xf32> to vector<4x18xf32>
    %c0_49 = arith.constant 0 : index
    %c0_50 = arith.constant 0 : index
    %95 = vector.load %arg7[%c0_49, %c0_50] : memref<4x326xf32, #tpu.memory_space<vmem>>, vector<4x18xf32>
    tpu.vector_store %arg7[%c0_49, %c0_50], %94 {strides = array<i32>} : memref<4x326xf32, #tpu.memory_space<vmem>>, vector<4x18xf32>,
    %96 = vector.extract_strided_slice %92 {offsets = [0, 252], sizes = [4, 18], strides = [1, 1]} : vector<4x288xf32> to vector<4x18xf32>
    %c0_51 = arith.constant 0 : index
    %c306 = arith.constant 306 : index
    %97 = vector.load %arg7[%c0_51, %c306] : memref<4x326xf32, #tpu.memory_space<vmem>>, vector<4x18xf32>
    tpu.vector_store %arg7[%c0_51, %c306], %96 {strides = array<i32>} : memref<4x326xf32, #tpu.memory_space<vmem>>, vector<4x18xf32>,
    %cst_52 = arith.constant 0.000000e+00 : f32
    %98 = vector.broadcast %cst_52 : f32 to vector<4x2xf32>
    %c0_53 = arith.constant 0 : index
    %c324 = arith.constant 324 : index
    %99 = vector.load %arg7[%c0_53, %c324] : memref<4x326xf32, #tpu.memory_space<vmem>>, vector<4x2xf32>
    tpu.vector_store %arg7[%c0_53, %c324], %98 {strides = array<i32>} : memref<4x326xf32, #tpu.memory_space<vmem>>, vector<4x2xf32>,
    %c0_54 = arith.constant 0 : index
    %c0_55 = arith.constant 0 : index
    %100 = vector.load %arg7[%c0_54, %c0_55] : memref<4x326xf32, #tpu.memory_space<vmem>>, vector<4x288xf32>
    %101 = arith.truncf %100 : vector<4x288xf32> to vector<4x288xbf16>
    %c0_56 = arith.constant 0 : index
    %c0_57 = arith.constant 0 : index
    %102 = vector.load %arg9[%c0_56, %c0_57] : memref<36x288xbf16, #tpu.memory_space<vmem>>, vector<4x288xbf16>
    tpu.vector_store %arg9[%c0_56, %c0_57], %101 {strides = array<i32>} : memref<36x288xbf16, #tpu.memory_space<vmem>>, vector<4x288xbf16>,
    %c0_58 = arith.constant 0 : index
    %c1_59 = arith.constant 1 : index
    %103 = vector.load %arg7[%c0_58, %c1_59] : memref<4x326xf32, #tpu.memory_space<vmem>>, vector<4x288xf32>
    %104 = arith.truncf %103 : vector<4x288xf32> to vector<4x288xbf16>
    %c4_60 = arith.constant 4 : index
    %c0_61 = arith.constant 0 : index
    %105 = vector.load %arg9[%c4_60, %c0_61] : memref<36x288xbf16, #tpu.memory_space<vmem>>, vector<4x288xbf16>
    tpu.vector_store %arg9[%c4_60, %c0_61], %104 {strides = array<i32>} : memref<36x288xbf16, #tpu.memory_space<vmem>>, vector<4x288xbf16>,
    %c0_62 = arith.constant 0 : index
    %c2_63 = arith.constant 2 : index
    %106 = vector.load %arg7[%c0_62, %c2_63] : memref<4x326xf32, #tpu.memory_space<vmem>>, vector<4x288xf32>
    %107 = arith.truncf %106 : vector<4x288xf32> to vector<4x288xbf16>
    %c8_64 = arith.constant 8 : index
    %c0_65 = arith.constant 0 : index
    %108 = vector.load %arg9[%c8_64, %c0_65] : memref<36x288xbf16, #tpu.memory_space<vmem>>, vector<4x288xbf16>
    tpu.vector_store %arg9[%c8_64, %c0_65], %107 {strides = array<i32>} : memref<36x288xbf16, #tpu.memory_space<vmem>>, vector<4x288xbf16>,
    %c0_66 = arith.constant 0 : index
    %c18_67 = arith.constant 18 : index
    %109 = vector.load %arg7[%c0_66, %c18_67] : memref<4x326xf32, #tpu.memory_space<vmem>>, vector<4x288xf32>
    %110 = arith.truncf %109 : vector<4x288xf32> to vector<4x288xbf16>
    %c12_68 = arith.constant 12 : index
    %c0_69 = arith.constant 0 : index
    %111 = vector.load %arg9[%c12_68, %c0_69] : memref<36x288xbf16, #tpu.memory_space<vmem>>, vector<4x288xbf16>
    tpu.vector_store %arg9[%c12_68, %c0_69], %110 {strides = array<i32>} : memref<36x288xbf16, #tpu.memory_space<vmem>>, vector<4x288xbf16>,
    %c0_70 = arith.constant 0 : index
    %c19_71 = arith.constant 19 : index
    %112 = vector.load %arg7[%c0_70, %c19_71] : memref<4x326xf32, #tpu.memory_space<vmem>>, vector<4x288xf32>
    %113 = arith.truncf %112 : vector<4x288xf32> to vector<4x288xbf16>
    %c16_72 = arith.constant 16 : index
    %c0_73 = arith.constant 0 : index
    %114 = vector.load %arg9[%c16_72, %c0_73] : memref<36x288xbf16, #tpu.memory_space<vmem>>, vector<4x288xbf16>
    tpu.vector_store %arg9[%c16_72, %c0_73], %113 {strides = array<i32>} : memref<36x288xbf16, #tpu.memory_space<vmem>>, vector<4x288xbf16>,
    %c0_74 = arith.constant 0 : index
    %c20_75 = arith.constant 20 : index
    %115 = vector.load %arg7[%c0_74, %c20_75] : memref<4x326xf32, #tpu.memory_space<vmem>>, vector<4x288xf32>
    %116 = arith.truncf %115 : vector<4x288xf32> to vector<4x288xbf16>
    %c20_76 = arith.constant 20 : index
    %c0_77 = arith.constant 0 : index
    %117 = vector.load %arg9[%c20_76, %c0_77] : memref<36x288xbf16, #tpu.memory_space<vmem>>, vector<4x288xbf16>
    tpu.vector_store %arg9[%c20_76, %c0_77], %116 {strides = array<i32>} : memref<36x288xbf16, #tpu.memory_space<vmem>>, vector<4x288xbf16>,
    %c0_78 = arith.constant 0 : index
    %c36_79 = arith.constant 36 : index
    %118 = vector.load %arg7[%c0_78, %c36_79] : memref<4x326xf32, #tpu.memory_space<vmem>>, vector<4x288xf32>
    %119 = arith.truncf %118 : vector<4x288xf32> to vector<4x288xbf16>
    %c24_80 = arith.constant 24 : index
    %c0_81 = arith.constant 0 : index
    %120 = vector.load %arg9[%c24_80, %c0_81] : memref<36x288xbf16, #tpu.memory_space<vmem>>, vector<4x288xbf16>
    tpu.vector_store %arg9[%c24_80, %c0_81], %119 {strides = array<i32>} : memref<36x288xbf16, #tpu.memory_space<vmem>>, vector<4x288xbf16>,
    %c0_82 = arith.constant 0 : index
    %c37_83 = arith.constant 37 : index
    %121 = vector.load %arg7[%c0_82, %c37_83] : memref<4x326xf32, #tpu.memory_space<vmem>>, vector<4x288xf32>
    %122 = arith.truncf %121 : vector<4x288xf32> to vector<4x288xbf16>
    %c28_84 = arith.constant 28 : index
    %c0_85 = arith.constant 0 : index
    %123 = vector.load %arg9[%c28_84, %c0_85] : memref<36x288xbf16, #tpu.memory_space<vmem>>, vector<4x288xbf16>
    tpu.vector_store %arg9[%c28_84, %c0_85], %122 {strides = array<i32>} : memref<36x288xbf16, #tpu.memory_space<vmem>>, vector<4x288xbf16>,
    %c0_86 = arith.constant 0 : index
    %c38_87 = arith.constant 38 : index
    %124 = vector.load %arg7[%c0_86, %c38_87] : memref<4x326xf32, #tpu.memory_space<vmem>>, vector<4x288xf32>
    %125 = arith.truncf %124 : vector<4x288xf32> to vector<4x288xbf16>
    %c32_88 = arith.constant 32 : index
    %c0_89 = arith.constant 0 : index
    %126 = vector.load %arg9[%c32_88, %c0_89] : memref<36x288xbf16, #tpu.memory_space<vmem>>, vector<4x288xbf16>
    tpu.vector_store %arg9[%c32_88, %c0_89], %125 {strides = array<i32>} : memref<36x288xbf16, #tpu.memory_space<vmem>>, vector<4x288xbf16>,
    %c0_90 = arith.constant 0 : index
    %c0_91 = arith.constant 0 : index
    %127 = vector.load %arg3[%c0_90, %c0_91] : memref<4x36xbf16, #tpu.memory_space<vmem>>, vector<4x36xbf16>
    %c0_92 = arith.constant 0 : index
    %c0_93 = arith.constant 0 : index
    %128 = vector.load %arg9[%c0_92, %c0_93] : memref<36x288xbf16, #tpu.memory_space<vmem>>, vector<36x288xbf16>
    %cst_94 = arith.constant dense<0.000000e+00> : vector<4x288xf32>
    %129 = tpu.matmul %127, %128, %cst_94 {dimension_numbers = #tpu.dot_dimension_numbers<[1], [0], [0], [1], [0, 0, 1, 1], [], []>} : vector<4x36xbf16>, vector<36x288xbf16>, vector<4x288xf32> -> vector<4x288xf32>
    %c0_95 = arith.constant 0 : index
    %c2_96 = arith.constant 2 : index
    %130 = vector.load %arg4[%c0_95, %c2_96] : memref<4x4xf32, #tpu.memory_space<vmem>>, vector<4x1xf32>
    %c0_97 = arith.constant 0 : index
    %c3 = arith.constant 3 : index
    %131 = vector.load %arg4[%c0_97, %c3] : memref<4x4xf32, #tpu.memory_space<vmem>>, vector<4x1xf32>
    %cst_98 = arith.constant 0.000000e+00 : f32
    %132 = vector.shape_cast %2 : vector<1x288xi1> to vector<1x288xi1>
    %133 = vector.broadcast %132 : vector<1x288xi1> to vector<4x288xi1>
    %134 = vector.broadcast %cst_98 : f32 to vector<4x288xf32>
    %135 = arith.select %133, %129, %134 : vector<4x288xi1>, vector<4x288xf32>
    %cst_99 = arith.constant dense<0.000000e+00> : vector<4xf32>
    %136 = vector.multi_reduction <add>, %135, %cst_99 [1] : vector<4x288xf32> to vector<4xf32>
    %137 = vector.shape_cast %136 : vector<4xf32> to vector<4x1xf32>
    %cst_100 = arith.constant 3.906250e-03 : f32
    %138 = vector.broadcast %cst_100 : f32 to vector<4x1xf32>
    %139 = arith.mulf %137, %138 : vector<4x1xf32>
    %140 = vector.broadcast %139 : vector<4x1xf32> to vector<4x288xf32>
    %141 = arith.subf %129, %140 : vector<4x288xf32>
    %cst_101 = arith.constant 0.000000e+00 : f32
    %142 = vector.shape_cast %2 : vector<1x288xi1> to vector<1x288xi1>
    %143 = vector.broadcast %142 : vector<1x288xi1> to vector<4x288xi1>
    %144 = vector.broadcast %cst_101 : f32 to vector<4x288xf32>
    %145 = arith.select %143, %141, %144 : vector<4x288xi1>, vector<4x288xf32>
    %146 = arith.mulf %145, %145 : vector<4x288xf32>
    %cst_102 = arith.constant dense<0.000000e+00> : vector<4xf32>
    %147 = vector.multi_reduction <add>, %146, %cst_102 [1] : vector<4x288xf32> to vector<4xf32>
    %148 = vector.shape_cast %147 : vector<4xf32> to vector<4x1xf32>
    %cst_103 = arith.constant 3.906250e-03 : f32
    %149 = vector.broadcast %cst_103 : f32 to vector<4x1xf32>
    %150 = arith.mulf %148, %149 : vector<4x1xf32>
    %cst_104 = arith.constant 9.99999974E-6 : f32
    %151 = vector.broadcast %cst_104 : f32 to vector<4x1xf32>
    %152 = arith.addf %150, %151 : vector<4x1xf32>
    %153 = math.rsqrt %152 : vector<4x1xf32>
    %154 = vector.broadcast %153 : vector<4x1xf32> to vector<4x288xf32>
    %155 = arith.mulf %141, %154 : vector<4x288xf32>
    %156 = vector.broadcast %130 : vector<4x1xf32> to vector<4x288xf32>
    %157 = arith.mulf %155, %156 : vector<4x288xf32>
    %158 = vector.broadcast %131 : vector<4x1xf32> to vector<4x288xf32>
    %159 = arith.addf %157, %158 : vector<4x288xf32>
    %c0_105 = arith.constant 0 : index
    %c0_106 = arith.constant 0 : index
    %c19_107 = arith.constant 19 : index
    %160 = vector.load %arg1[%c0_105, %c0_106, %c19_107] : memref<1x4x326xf32, #tpu.memory_space<vmem>>, vector<1x4x288xf32>
    %161 = vector.shape_cast %160 : vector<1x4x288xf32> to vector<4x288xf32>
    %162 = arith.addf %159, %161 : vector<4x288xf32>
    %c0_108 = arith.constant 0 : index
    %c0_109 = arith.constant 0 : index
    %c0_110 = arith.constant 0 : index
    %163 = vector.load %arg6[%c0_108, %c0_109, %c0_110] : memref<1x4x288xf32, #tpu.memory_space<vmem>>, vector<1x4x288xf32>
    %164 = vector.shape_cast %163 : vector<1x4x288xf32> to vector<4x288xf32>
    %165 = vector.shape_cast %162 : vector<4x288xf32> to vector<1x4x288xf32>
    tpu.vector_store %arg6[%c0_108, %c0_109, %c0_110], %165 {strides = array<i32>} : memref<1x4x288xf32, #tpu.memory_space<vmem>>, vector<1x4x288xf32>,
    return
  }
  func.func @transform_0(%arg0: i32) -> (i32, i32, i32) {
    %c0_i32 = arith.constant 0 : i32
    %c0_i32_0 = arith.constant 0 : i32
    %c0_i32_1 = arith.constant 0 : i32
    return %arg0, %c0_i32, %c0_i32_0 : i32, i32, i32
  }
  func.func @transform_1(%arg0: i32) -> (i32, i32) {
    %c0_i32 = arith.constant 0 : i32
    %c0_i32_0 = arith.constant 0 : i32
    %c0_i32_1 = arith.constant 0 : i32
    return %c0_i32, %c0_i32_0 : i32, i32
  }
  func.func @transform_2(%arg0: i32) -> (i32, i32) {
    %c0_i32 = arith.constant 0 : i32
    %c0_i32_0 = arith.constant 0 : i32
    %c0_i32_1 = arith.constant 0 : i32
    return %c0_i32, %c0_i32_0 : i32, i32
  }
  func.func @transform_3(%arg0: i32) -> (i32, i32) {
    %c0_i32 = arith.constant 0 : i32
    %c0_i32_0 = arith.constant 0 : i32
    %c0_i32_1 = arith.constant 0 : i32
    return %c0_i32, %c0_i32_0 : i32, i32
  }
  func.func @transform_4(%arg0: i32) -> (i32, i32) {
    %c0_i32 = arith.constant 0 : i32
    %c0_i32_0 = arith.constant 0 : i32
    %c0_i32_1 = arith.constant 0 : i32
    return %c0_i32, %c0_i32_0 : i32, i32
  }
  func.func @transform_5(%arg0: i32) -> (i32, i32, i32) {
    %c0_i32 = arith.constant 0 : i32
    %c0_i32_0 = arith.constant 0 : i32
    %c0_i32_1 = arith.constant 0 : i32
    return %arg0, %c0_i32, %c0_i32_0 : i32, i32, i32
  }
}

</mosaic_0001>

<bundles_post_ra>
// kernel: tpu_custom_call.1
= control target key start
LH: loop header
LB: loop body
LE: loop exit
PB: predicated region body
PF: predicated region fallthrough
CT: control target
= control target key end

     0   :  { %10 = vsyncpa [#allocation6], 0  ;;  %s2378_s0 = inlined_call_operand.hbm [shape: f32[2,4,326], index: 0, kind: input, shape index: {}]   ;;  %s2379_s1 = inlined_call_operand.hbm [shape: bf16[4,36], index: 1, kind: input, shape index: {}]   ;;  %s2380_s2 = inlined_call_operand.hbm [shape: bf16[4,36], index: 2, kind: input, shape index: {}]   ;;  %s2381_s3 = inlined_call_operand.vmem [shape: f32[4,4], index: 3, kind: input, shape index: {}]   ;;  %s2382_s4 = inlined_call_operand.vmem [shape: s32[1,288], index: 4, kind: input, shape index: {}]   ;;  %s2383_s5 = inlined_call_operand.hbm [shape: f32[2,4,288], index: 5, kind: output, shape index: {}]  }
   0x1   :  { %12 = vsyncpa [#allocation6 + $0x1], 0 }
   0x2   :  { %13 = vsyncpa [#allocation9], 0 }
   0x3   :  { %14 = vsyncpa [#allocation7], 0 }
   0x4   :  { %16 = vsyncpa [#allocation7 + $0x1], 0  ;;  %s1925_s18 = smov 0   ;;  %s1927_s19 = smov 0  }
   0x5   :  { %s1929_s20 = smov 0   ;;  %s1931_s21 = smov 0  }
   0x6 LB: > { %s1946_s22 = sadd.s32 4294967295, %s1868_s21   ;;  %s1451_s23 = sadd.s32 4294967294, %s1868_s21   ;;  %s1868_s21 = sphi %s1931_s21, %s2439_s21   ;;  %s1864_s20 = sphi %s1929_s20, %s2438_s20   ;;  %s1860_s19 = sphi %s1927_s19, %s2437_s19   ;;  %s1856_s18 = sphi %s1925_s18, %s2436_s18  }
   0x7   : > { %p42_p0 = scmp.ne.s32.totalorder %s1860_s19, %s1856_s18  ;;  %p2384_p1 = scmp.eq.s32.totalorder %s1946_s22, 0 }
   0x8   : > { %p156_p3 = scmp.eq.s32.totalorder %s1451_s23, 1  ;;  %p1452_p5 = scmp.ge.s32.totalorder %s1868_s21, 1 }
   0x9   : > { %p1955_p4 = por %p2384_p1, %p42_p0  ;;  %p163_p7 = scmp.lt.s32.totalorder %s1868_s21, 3 }
   0xa   : > { %p1960_p6 = por %p156_p3, %p42_p0  ;;  %s1870_s27 = smov [#allocation8]  }
   0xb   : > { %s2397_s24 = scalar_select %p1955_p4, 1, 0 }
   0xc   : > { %s2398_s25 = scalar_select %p1960_p6, 1, 0 }
   0xd   : > { %p1965_p8 = pnand %p1452_p5, %p163_p7  ;;  %s176_s28 = sshll.u32 %s1870_s27, 4  ;;  %s177_s28 = int_to_ptr.vmem [resolvable:$true] %s176_s28 }
   0xe   : > { %s1871_s29 = smov [#allocation10]   ;;  %s1981_s7 = sadd.s32 1, %s1868_s21  }
   0xf   : > { %s2399_s26 = scalar_select %p1965_p8, 1, 0 }
  0x10   : > { %p1603_p10 = pneg %p1965_p8  ;;  %s187_s30 = sshll.u32 %s1871_s29, 4  ;;  %s1978_s30 = int_to_ptr.vmem [resolvable:$true] %s187_s30 }
  0x11   : > { %s26_s8 = ssub.s32 %s1868_s21, %s1981_s7  ;;  %s1712_s11 = scalar_lea.hbm %s2379_s1, 32 }
  0x12   : > { %p1974_p11 = pnand %p1603_p10, %p2384_p1  ;;  %p1713_p12 = scmp.ne.s32.totalorder %s2379_s1, %s1712_s11 }
  0x13   : > { %p1719_p5 = scmp.lt.u32.totalorder %s1712_s11, %s2379_s1 }
  0x14   : > { %p1714_p13 = pneg %p1974_p11 }
  0x16   : > { %p1715_p0 = pnand %p1714_p13, %p1713_p12 }
  0x18   : > { %p1716_p3 = pneg %p1715_p0 }
  0x1a   : > { %p1721_p7 = pnand %p1719_p5, %p1716_p3 }
  0x1c   : > { %1724 = shalt.err (!%p1721_p7)
}
  0x1d   : > { %s1725_s16 = scalar_lea.vmem %s177_s28, 32  ;;  %p1733_p2 = scmp.lt.s32.totalorder %s177_s28, %s177_s28 }
  0x1e   : > { %p1726_p10 = scmp.ne.s32.totalorder %s177_s28, %s1725_s16  ;;  %p1734_p6 = scmp.lt.s32.totalorder %s1725_s16, %s1725_s16 }
  0x20   : > { %p1728_p9 = pnand %p1726_p10, %p1714_p13  ;;  %p1735_p4 = por %p1734_p6, %p1733_p2 }
  0x22   : > { %p1729_p1 = pneg %p1728_p9 }
  0x24   : > { %p1736_p8 = pnand %p1735_p4, %p1729_p1 }
  0x26   : > { %1739 = shalt.err (!%p1736_p8)
}
  0x27   : > { %1606 = dma.hbm_to_vmem [thread:$0]  (!%p1974_p11), %s2379_s1, 32, %s177_s28, [#allocation9]  }
  0x28   : > { %s1740_s9 = scalar_lea.hbm %s2380_s2, 32 }
  0x29   : > { %p1741_p9 = scmp.ne.s32.totalorder %s2380_s2, %s1740_s9  ;;  %p1747_p4 = scmp.lt.u32.totalorder %s1740_s9, %s2380_s2 }
  0x2b   : > { %p1743_p2 = pnand %p1741_p9, %p1714_p13 }
  0x2d   : > { %p1744_p1 = pneg %p1743_p2 }
  0x2f   : > { %p1749_p6 = pnand %p1747_p4, %p1744_p1 }
  0x31   : > { %1752 = shalt.err (!%p1749_p6)
}
  0x32   : > { %s1753_s28 = scalar_lea.vmem %s1978_s30, 32  ;;  %p1761_p3 = scmp.lt.s32.totalorder %s1978_s30, %s1978_s30 }
  0x33   : > { %p1754_p8 = scmp.ne.s32.totalorder %s1978_s30, %s1753_s28  ;;  %p1762_p5 = scmp.lt.s32.totalorder %s1753_s28, %s1753_s28 }
  0x35   : > { %p1756_p12 = pnand %p1754_p8, %p1714_p13  ;;  %p1763_p7 = por %p1762_p5, %p1761_p3 }
  0x37   : > { %p1757_p0 = pneg %p1756_p12 }
  0x39   : > { %p1764_p10 = pnand %p1763_p7, %p1757_p0 }
  0x3b   : > { %1767 = shalt.err (!%p1764_p10)
}
  0x3c   : > { %1609 = dma.hbm_to_vmem [thread:$0]  (!%p1974_p11), %s2380_s2, 32, %s1978_s30, [#allocation9]  }
  0x3d   : > { %p27_p13 = scmp.eq.s32.totalorder %s26_s8, 0  ;;  %s29_s16 = sadd.s32 1, %s1864_s20 }
  0x3e   : > { %p36_p9 = scmp.ne.s32.totalorder %s1864_s20, %s1860_s19  ;;  %p37_p2 = scmp.eq.s32.totalorder %s1868_s21, 0 }
  0x3f   : > { %s2040_s6 = scalar_select %p27_p13, %s1864_s20, %s29_s16  }
  0x40   : > { %p38_p1 = por %p37_p2, %p36_p9  ;;  %p2401_p4 = scmp.eq.s32.totalorder %s1946_s22, 1 }
  0x41   : > { %p1620_p8 = scmp.lt.s32.totalorder %s1868_s21, 2  ;;  %s204_s23 = sand.u32 1, %s1864_s20  }
  0x42   : > { %p2044_p6 = por %p2401_p4, %p36_p9  ;;  %s1587_s27 = smul.u32 12, %s204_s23 }
  0x43   : > { %s1588_s29 = smul.u32 192, %s1868_s21  ;;  %p2051_p12 = pnand %p1620_p8, %p38_p1 }
  0x44   : > { %s208_s11 = scalar_lea.vmem [#allocation5], %s1587_s27  ;;  %s205_s13 = scalar_lea.sflag [#allocation6], %s204_s23 }
  0x45   : > { %s2058_s10 = scalar_lea.hbm %s2378_s0, %s1588_s29  ;;  %s216_s12 = sshll.u32 %s208_s11, 4  ;;  %s2060_s12 = int_to_ptr.vmem [resolvable:$true] %s216_s12 }
  0x46   : > { %s1768_s28 = scalar_lea.hbm %s2058_s10, 192  ;;  %p1770_p0 = pneg %p2051_p12 }
  0x47   : > { %p1769_p11 = scmp.ne.s32.totalorder %s2058_s10, %s1768_s28  ;;  %s1773_s16 = scalar_lea.hbm %s2378_s0, 384 }
  0x48   : > { %p1774_p7 = scmp.lt.u32.totalorder %s2058_s10, %s2378_s0  ;;  %p1775_p10 = scmp.lt.u32.totalorder %s1773_s16, %s1768_s28 }
  0x49   : > { %p1771_p3 = pnand %p1770_p0, %p1769_p11  ;;  %p1777_p9 = scmp.lt.u32.totalorder %s1768_s28, %s2058_s10 }
  0x4a   : > { %p1776_p13 = por %p1775_p10, %p1774_p7 }
  0x4b   : > { %p1772_p5 = pneg %p1771_p3 }
  0x4c   : > { %p1778_p2 = por %p1777_p9, %p1776_p13 }
  0x4e   : > { %p1779_p1 = pnand %p1778_p2, %p1772_p5 }
  0x50   : > { %1782 = shalt.err (!%p1779_p1)
}
  0x51   : > { %s1783_s23 = scalar_lea.vmem %s2060_s12, 192  ;;  %s1872_s27 = smov [#allocation5]  }
  0x52   : > { %p1784_p4 = scmp.ne.s32.totalorder %s2060_s12, %s1783_s23  ;;  %s1788_s8 = sshll.u32 %s1872_s27, 4  ;;  %s1789_s8 = int_to_ptr.vmem [resolvable:$false] %s1788_s8 }
  0x53   : > { %s1790_s11 = scalar_lea.vmem %s1789_s8, 384  ;;  %p1791_p3 = scmp.lt.s32.totalorder %s2060_s12, %s1789_s8 }
  0x54   : > { %p1786_p8 = pnand %p1784_p4, %p1770_p0  ;;  %p1792_p7 = scmp.lt.s32.totalorder %s1790_s11, %s1783_s23 }
  0x56   : > { %p1787_p11 = pneg %p1786_p8  ;;  %p1793_p10 = por %p1792_p7, %p1791_p3 }
  0x58   : > { %p1794_p13 = pnand %p1793_p10, %p1787_p11 }
  0x5a   : > { %1797 = shalt.err (!%p1794_p13)
}
  0x5b   : > { %1613 = dma.hbm_to_vmem [thread:$0]  (!%p2051_p12), %s2058_s10, 192, %s2060_s12, %s205_s13  }
  0x5c   : > { %p2404_p5 = scmp.ne.s32.totalorder %s2399_s26, 0 }
  0x5d   : > { %s2090_s28 = sand.u32 (!%p2404_p5), 1, %s1860_s19   ;;  %p2405_p0 = scmp.ne.s32.totalorder (!%p2404_p5), %s2397_s24, 0 }
  0x5e   : > { %225 = sbr.rel (%p2404_p5) target bundleno = 1808 (0x710), region = 40  ;;  %s228_s15 = scalar_lea.sflag (!%p2404_p5), [#allocation6], %s2090_s28 }
  0x5f   : > { %s1589_s14 = smul.u32 (!%p2404_p5), 12, %s2090_s28 }
  0x61   : > { %s2096_s16 = scalar_lea.vmem (!%p2404_p5), [#allocation5], %s1589_s14 }
  0x65   : > { %1843 = dma.done.wait (%p2405_p0), %s228_s15, 192  }
  0x66   : > { %1845 = vsyncadd (%p2405_p0), %s228_s15, 4294967104  ;;  %p2406_p12 = scmp.eq.s32.totalorder %s1946_s22, 0 }
  0x68   : > { %1847 = dma.done.wait (%p2406_p12), [#allocation9], 64   ;;  %p2407_p9 = pmov %p2406_p12 }
  0x69   : > { %v324_v0 = vld [vmem:[%s2096_s16 + $0x8] sm:$0xf]  ;;  %v383_v5 = vld [vmem:[%s2096_s16] sm:$0xff]  ;;  %s1873_s24 = smov 126   ;;  %vm288_vm0 = vcmask 254976   ;;  %s1874_s26 = smov 127  }
  0x6a   : > { %1849 = vsyncadd (%p2407_p9), [#allocation9], 4294967232  ;;  %v291_v1 = vld [vmem:[%s2096_s16 + $0x8] sm:$0xf]  ;;  %v1528_v3 = vpack.c.bf16 %v324_v0, %v324_v0  ;;  %v386_v6 = vcombine.high %v383_v5, %v383_v5  ;;  %s1875_s9 = smov 109   ;;  %v1876_v16 = vmov 0.0  }
  0x6b   : > { %v384_v2 = vld [vmem:[%s2096_s16 + $0x8] sm:$0xf]  ;;  %v1526_v4 = vpack.c.bf16 %v291_v1, %v291_v1  ;;  %1567 = vmatprep.subr.bf16.mxu1 %v1876_v16  ;;  %s1877_s10 = smov 110   ;;  %s1878_s12 = smov 108   ;;  %v1882_v27 = vmov 0   ;;  %vm1883_vm1 = vmmov 0  }
  0x6c   : > { %341 = vrot.lane.b32.xlu1 %v1528_v3, %s1873_s24  ;;  %v1532_v8 = vpack.c.bf16 %v384_v2, %v384_v2  ;;  %v270_v9 = vld [vmem:[%s2096_s16 + $0x8] sm:$0xf]  ;;  %v1531_v10 = vpack.c.bf16 %v386_v6, %v383_v5  ;;  %s1879_s13 = smov 92   ;;  %s1880_s29 = smov 91   ;;  %629 = vmatprep.mubr.bf16.mxu0 %v1882_v27  ;;  %vm2396_vm2 = vcmask 257026   ;;  %vm314_vm3 = vcmask 1043456  }
  0x6d   : > { %v307_v7 = vrot.slane %v1526_v4, 6  ;;  %v353_v11 = vld [vmem:[%s2096_s16 + $0x8] sm:$0xf]  ;;  %v1524_v12 = vpack.c.bf16 %v270_v9, %v270_v9  ;;  %s1881_s30 = smov 90   ;;  %1573 = vmatprep.mubr.msk.bf16.mxu1 %vm1883_vm1, %v1876_v16  ;;  %1679 = vset.pattern.permute.xlu0 %v1882_v27  ;;  %vm406_vm4 = vcmask 891904   ;;  %vm346_vm5 = vcmask 1031168  }
  0x6e   : > { %287 = vst [vmem:[#allocation3] sm:$0x33] %v1531_v10  ;;  %v1530_v13 = vpack.c.bf16 %v353_v11, %v353_v11  ;;  %v413_v14 = vld [vmem:[%s2096_s16 + $0x8] sm:$0xf]  ;;  %v306_v15 = vrot.slane %v1531_v10, 6  ;;  %vm2394_vm6 = vcmask 1039360  }
  0x6f   : > { %310 = vrot.lane.b32.xlu0 %v307_v7, %s1874_s26  ;;  %289 = vst.msk [vmem:[#allocation3 + $0x8] sm:$0x3] %vm288_vm0, %v1524_v12  ;;  %v1534_v18 = vpack.c.bf16 %v413_v14, %v413_v14  ;;  %v444_v20 = vld [vmem:[%s2096_s16 + $0x8] sm:$0xf]  ;;  %vm2393_vm7 = vcmask 900096   ;;  %vm2392_vm8 = vcmask 883712  }
  0x70   : > { %401 = vrot.lane.b32.xlu1 %v1532_v8, %s1875_s9  ;;  %v369_v17 = vrot.slane %v1530_v13, 6  ;;  %v473_v21 = vld [vmem:[%s2096_s16 + $0x8] sm:$0xf]  ;;  %v1536_v22 = vpack.c.bf16 %v444_v20, %v444_v20  ;;  %vm2395_vm9 = vcmask 752640   ;;  %vm2391_vm10 = vcmask 744448   ;;  %s1885_s15 = smov 99  }
  0x71   : > { %v429_v19 = vrot.slane %v1534_v18, 6  ;;  %v1538_v23 = vpack.c.bf16 %v473_v21, %v473_v21  ;;  %v504_v25 = vld [vmem:[%s2096_s16 + $0x8] sm:$0xf]  ;;  %vm2390_vm11 = vcmask 736256   ;;  %vm2389_vm12 = vcmask 1041408   ;;  %s1886_s23 = smov 97  }
  0x72   : > { %v1540_v26 = vpack.c.bf16 %v504_v25, %v504_v25  ;;  %vm2387_vm13 = vcmask 293888   ;;  %s1887_s27 = smov 3   ;;  %s1888_s8 = smov 1  }
  0x73   : > { %399 = vrot.lane.b32.xlu0 %v1531_v10, %s1875_s9  ;;  %v489_v24 = vrot.slane %v1538_v23, 6  ;;  %v532_v23 = vld [vmem:[#allocation8] sm:$0x3]  ;;  %s1889_s11 = smov 31  }
  0x74   : > { %339 = vrot.lane.b32.xlu1 %v1531_v10, %s1873_s24 }
  0x77   : > { %308 = vrot.lane.b32.xlu0 %v306_v15, %s1874_s26 }
  0x78   : > { %372 = vrot.lane.b32.xlu1 %v369_v17, %s1877_s10 }
  0x7b   : > { %370 = vrot.lane.b32.xlu0 %v306_v15, %s1877_s10 }
  0x7c   : > { %432 = vrot.lane.b32.xlu1 %v429_v19, %s1878_s12 }
  0x7f   : > { %430 = vrot.lane.b32.xlu0 %v306_v15, %s1878_s12 }
  0x80   : > { %461 = vrot.lane.b32.xlu1 %v1536_v22, %s1879_s13 }
  0x83   : > { %459 = vrot.lane.b32.xlu0 %v1531_v10, %s1879_s13 }
  0x84   : > { %492 = vrot.lane.b32.xlu1 %v489_v24, %s1880_s29 }
  0x87   : > { %490 = vrot.lane.b32.xlu0 %v306_v15, %s1880_s29 }
  0x88   : > { %521 = vrot.lane.b32.xlu1 %v1540_v26, %s1881_s30 }
  0x8b   : > { %519 = vrot.lane.b32.xlu0 %v1531_v10, %s1881_s30 }
  0xde   : > { %v342_v28 = vpop.permute.xlu1 %341 }
  0xdf   : > { %351 = vst.msk [vmem:[#allocation3 + $0x14] sm:$0x3] %vm288_vm0, %v342_v28  ;;  %v344_v35 = vrot.slane %v342_v28, 4 }
  0xe1   : > { %v311_v29 = vpop.permute.xlu0 %310 }
  0xe2   : > { %322 = vst.msk [vmem:[#allocation3 + $0x8] sm:$0xc] %vm2396_vm2, %v311_v29  ;;  %v402_v30 = vpop.permute.xlu1 %401  ;;  %v313_v40 = vrot.slane %v311_v29, 4  ;;  %v680_v29 = vlaneseq }
  0xe3   : > { %v404_v31 = vrot.slane %v402_v30, 4  ;;  %411 = vst.msk [vmem:[#allocation3 + $0x20] sm:$0x3] %vm288_vm0, %v402_v30  ;;  %v2176_v30 = vld [vmem:[%s2382_s4] sm:$0x7] }
  0xe4   : > { %vm268_vm14 = vcmp.lt.s32.totalorder %v2176_v30, 16 }
  0xe5   : > { %v400_v32 = vpop.permute.xlu0 %399 }
  0xe6   : > { %v403_v33 = vrot.slane %v400_v32, 4  ;;  %v340_v34 = vpop.permute.xlu1 %339 }
  0xe7   : > { %v343_v37 = vrot.slane %v340_v34, 4 }
  0xe8   : > { %v405_v36 = vsel %vm314_vm3, %v403_v33, %v404_v31  ;;  %v681_v31 = vshrl.u32 %v680_v29, 7 }
  0xe9   : > { %v407_v38 = vsel %vm406_vm4, %v400_v32, %v405_v36  ;;  %v309_v39 = vpop.permute.xlu0 %308  ;;  %v345_v41 = vsel %vm314_vm3, %v343_v37, %v344_v35 }
  0xea   : > { %410 = vst [vmem:[#allocation3 + $0x18] sm:$0x33] %v407_v38  ;;  %v312_v42 = vrot.slane %v309_v39, 4  ;;  %v347_v43 = vsel %vm346_vm5, %v340_v34, %v345_v41  ;;  %v373_v44 = vpop.permute.xlu1 %372  ;;  %v2179_v32 = vsub.s32 2, %v681_v31  ;;  %v2181_v33 = vsub.s32 0, %v681_v31 }
  0xeb   : > { %350 = vst [vmem:[#allocation3 + $0xc] sm:$0x33] %v347_v43  ;;  %v375_v46 = vrot.slane %v373_v44, 4  ;;  %382 = vst.msk [vmem:[#allocation3 + $0x14] sm:$0xc] %vm2396_vm2, %v373_v44  ;;  %v679_v34 = vsel %vm268_vm14, 1, %v1882_v27 }
  0xec   : > { %v315_v45 = vsel %vm314_vm3, %v312_v42, %v313_v40  ;;  %v2184_v35 = vsub.s32 1, %v681_v31  ;;  %v691_v37 = vrot.slane %v679_v34, %v2179_v32  ;;  %v683_v38 = vrot.slane %v679_v34, %v2181_v33  ;;  %v1322_v44 = vld [vmem:[%s2096_s16 + $0x8] sm:$0xf] }
  0xed   : > { %v317_v47 = vsel %vm2394_vm6, %v309_v39, %v315_v45  ;;  %v371_v48 = vpop.permute.xlu0 %370 }
  0xee   : > { %320 = vst [vmem:[#allocation3] sm:$0xcc] %v317_v47  ;;  %v374_v49 = vrot.slane %v371_v48, 4  ;;  %v433_v50 = vpop.permute.xlu1 %432  ;;  %v687_v40 = vrot.slane %v679_v34, %v2184_v35  ;;  %vm2189_vm15 = vcmp.eq.s32.totalorder %v691_v37, 1 }
  0xef   : > { %v435_v52 = vrot.slane %v433_v50, 4  ;;  %442 = vst.msk [vmem:[#allocation3 + $0x20] sm:$0xc] %vm2396_vm2, %v433_v50 }
  0xf0   : > { %v376_v51 = vsel %vm314_vm3, %v374_v49, %v375_v46  ;;  %vm2197_vm14 = vcmp.eq.s32.totalorder %v687_v40, 1 }
  0xf1   : > { %v378_v53 = vsel %vm2393_vm7, %v371_v48, %v376_v51  ;;  %v431_v54 = vpop.permute.xlu0 %430 }
  0xf2   : > { %381 = vst [vmem:[#allocation3 + $0xc] sm:$0xcc] %v378_v53  ;;  %v434_v55 = vrot.slane %v431_v54, 4  ;;  %v462_v56 = vpop.permute.xlu1 %461  ;;  %v1685_v57 = vld [vmem:[#allocation3 + $0x8] ss:$12 sps:$4 sm:$0xff]  }
  0xf3   : > { %v464_v59 = vrot.slane %v462_v56, 4  ;;  %471 = vst.msk [vmem:[#allocation3 + $0x2c] sm:$0x3] %vm288_vm0, %v462_v56  ;;  %1568 = vmatpush3.bf16.msra.mxu1 %v1685_v57 }
  0xf4   : > { %v436_v58 = vsel %vm314_vm3, %v434_v55, %v435_v52  ;;  %1569 = vmatprep.subr.bf16.mxu1 %v1876_v16 }
  0xf5   : > { %v438_v60 = vsel %vm2392_vm8, %v431_v54, %v436_v58  ;;  %v460_v61 = vpop.permute.xlu0 %459  ;;  %v533_v4 = vld [vmem:[#allocation3] sm:$0xff]  ;;  %v678_v58 = vld [vmem:[%s2381_s3] sm:$0xf] }
  0xf6   : > { %441 = vst [vmem:[#allocation3 + $0x18] sm:$0xcc] %v438_v60  ;;  %v463_v62 = vrot.slane %v460_v61, 4  ;;  %v493_v63 = vpop.permute.xlu1 %492 }
  0xf7   : > { %v495_v1 = vrot.slane %v493_v63, 4  ;;  %502 = vst.msk [vmem:[#allocation3 + $0x2c] sm:$0xc] %vm2396_vm2, %v493_v63  ;;  %vm863_vm2 = vcmask 142336  }
  0xf8   : > { %v465_v0 = vsel %vm314_vm3, %v463_v62, %v464_v59  ;;  %v1884_v59 = vmov 1  }
  0xf9   : > { %v467_v2 = vsel %vm2395_vm9, %v460_v61, %v465_v0  ;;  %v491_v3 = vpop.permute.xlu0 %490  ;;  %v535_v5 = vld [vmem:[#allocation3 + $0xc] sm:$0xff]  ;;  %1680 = vset.pattern.permute.xlu1 %v1884_v59 }
  0xfa   : > { %v1686_v6 = vld [vmem:[#allocation3 + $0x4] ss:$12 sps:$4 sm:$0xff]   ;;  %470 = vst [vmem:[#allocation3 + $0x24] sm:$0x33] %v467_v2  ;;  %v494_v7 = vrot.slane %v491_v3, 4  ;;  %v1478_v8 = vcombine.low %v533_v4, %v535_v5  ;;  %v522_v9 = vpop.permute.xlu1 %521 }
  0xfb   : > { %597 = vmatprep.subr.bf16.mxu0 %v1686_v6  ;;  %v524_v11 = vrot.slane %v522_v9, 4  ;;  %531 = vst.msk [vmem:[#allocation3 + $0x38] sm:$0x3] %vm288_vm0, %v522_v9 }
  0xfc   : > { %v496_v10 = vsel %vm314_vm3, %v494_v7, %v495_v1  ;;  %598 = vmatpush1.bf16.msra.mxu0 %v1478_v8 }
  0xfd   : > { %v498_v12 = vsel %vm2391_vm10, %v491_v3, %v496_v10  ;;  %v520_v13 = vpop.permute.xlu0 %519 }
  0xfe   : > { %501 = vst [vmem:[#allocation3 + $0x24] sm:$0xcc] %v498_v12  ;;  %v523_v14 = vrot.slane %v520_v13, 4  ;;  %v1688_v15 = vld [vmem:[#allocation3 + $0x20] ss:$12 sps:$4 sm:$0xff]  }
  0xff   : > { %1570 = vmatpush3.bf16.msra.mxu1 %v1688_v15 }
 0x100   : > { %v525_v17 = vsel %vm314_vm3, %v523_v14, %v524_v11  ;;  %1571 = vmatprep.subr.bf16.mxu1 %v1876_v16 }
 0x101   : > { %v527_v18 = vsel %vm2390_vm11, %v520_v13, %v525_v17  ;;  %vm760_vm11 = vcmask 7168  }
 0x102   : > { %530 = vst [vmem:[#allocation3 + $0x30] sm:$0x33] %v527_v18  ;;  %v1692_v19 = vld [vmem:[#allocation3 + $0x38] ss:$0 sps:$4 sm:$0x33]  }
 0x103   : > { %v595_v22 = vsel %vm2389_vm12, %v1692_v19, 0 }
 0x104   : > { %1572 = vmatpush3.bf16.msra.mxu1 %v595_v22 }
 0x105   : > { %v1689_v20 = vld [vmem:[#allocation3 + $0x1c] ss:$12 sps:$4 sm:$0xff]   ;;  %v1691_v21 = vld [vmem:[#allocation3 + $0x18] ss:$12 sps:$4 sm:$0xff]   ;;  %1577 = vmatprep.subr.bf16.mxu1 %v1876_v16 }
 0x106   : > { %599 = vmatprep.subr.bf16.mxu0 %v1689_v20 }
 0x107   : > { %600 = vmatpush1.bf16.msra.mxu0 %v1691_v21  ;;  %1574 = vmatmul.mubr.msk.bf16.vlgmr.msra.gmra.mrb[0].mxu1 %vm2387_vm13, %v532_v23 }
 0x108   : > { %1583 = vmatprep.mubr.msk.bf16.mxu1 %vm1883_vm1, %v1876_v16  ;;  %vm2193_vm1 = vcmp.eq.s32.totalorder %v683_v38, 1 }
 0x109   : > { %v541_v24 = vld [vmem:[#allocation3 + $0x30] sm:$0x33] }
 0x10a   : > { %v1485_v25 = vcombine.high %v541_v24, %v541_v24  ;;  %v1484_v26 = vcombine.low %v541_v24, %v541_v24 }
 0x10c   : > { %1487 = vmatprep.subr.msk.bf16.mxu0 %vm2389_vm12, %v1485_v25  ;;  %v589_v28 = vsel %vm2389_vm12, %v1484_v26, 0  ;;  %vm804_vm12 = vcmp.eq.s32.totalorder %v2176_v30, 17 }
 0x10d   : > { %602 = vmatpush1.bf16.msra.mxu0 %v589_v28 }
 0x110   : > { %1488 = vmatmul.mubr.msk.bf16.vlgmr.msra.gmra.mrb[0].mxu0 %vm2387_vm13, %v532_v23  ;;  %vm2388_vm13 = vcmask 257024  }
 0x111   : > { %1223 = vmatprep.mubr.bf16.mxu0 %v1882_v27 }
 0x1da   : > { %v672_v36 = vpop.f32.mrb[0].mxu1 }
 0x1db   : > { %v1575_v39 = vpop.f32.mrb[1].mxu1  ;;  %v697_v47 = vsel %vm2189_vm15, %v672_v36, 0.0 }
 0x1dc   : > { %v675_v41 = vpop.f32.mrb[2].mxu1  ;;  %v703_v55 = vsel %vm2388_vm13, %v697_v47, 0.0 }
 0x1dd   : > { %v1576_v42 = vpop.f32.mrb[3].mxu1 }
 0x1de   : > { %v821_v42 = vsel %vm804_vm12, 1, %v1882_v27  ;;  %vm814_vm12 = vcmask 23552  }
 0x1e3   : > { %v631_v46 = vpop.f32.mrb[0].mxu0 }
 0x1e4   : > { %v695_v48 = vsel %vm2193_vm1, %v631_v46, 0.0  ;;  %v633_v49 = vpop.f32.mrb[1].mxu0 }
 0x1e5   : > { %v699_v50 = vsel %vm314_vm3, %v695_v48, 0.0  ;;  %v696_v51 = vsel %vm2197_vm14, %v633_v49, 0.0  ;;  %v635_v52 = vpop.f32.mrb[2].mxu0 }
 0x1e6   : > { %v700_v53 = vsel %vm314_vm3, %v696_v51, 0.0  ;;  %v636_v54 = vpop.f32.mrb[3].mxu0 }
 0x1e7   : > { %v701_v56 = vadd.f32 %v700_v53, %v699_v50  ;;  %v829_v50 = vrot.slane %v821_v42, %v2184_v35 }
 0x1e9   : > { %v704_v57 = vadd.f32 %v703_v55, %v701_v56  ;;  %vm835_vm7 = vcmp.eq.s32.totalorder %v829_v50, 1 }
 0x1eb   : > { %705 = vadd.xlane.f32.xlu0 %v704_v57 }
 0x201   : > { %732 = vperm.xlu0 %1679, %v678_v58  }
 0x278   : > { %v706_v60 = vpop.xlane.xlu0 %705 }
 0x279   : > { %v707_v61 = vmul.f32 0.00390625, %v706_v60 }
 0x27b   : > { %v708_v62 = vsub.f32 %v631_v46, %v707_v61  ;;  %v709_v63 = vsub.f32 %v633_v49, %v707_v61  ;;  %v710_v0 = vsub.f32 %v672_v36, %v707_v61  ;;  %v825_v49 = vrot.slane %v821_v42, %v2181_v33 }
 0x27d   : > { %v711_v1 = vsel %vm2193_vm1, %v708_v62, 0.0  ;;  %v712_v2 = vsel %vm2197_vm14, %v709_v63, 0.0  ;;  %v713_v3 = vsel %vm2189_vm15, %v710_v0, 0.0  ;;  %vm834_vm8 = vcmp.eq.s32.totalorder %v825_v49, 1 }
 0x27e   : > { %v714_v4 = vmul.f32 %v711_v1, %v711_v1  ;;  %v715_v5 = vmul.f32 %v712_v2, %v712_v2  ;;  %v716_v6 = vmul.f32 %v713_v3, %v713_v3 }
 0x280   : > { %v717_v7 = vsel %vm314_vm3, %v714_v4, 0.0  ;;  %v718_v8 = vsel %vm314_vm3, %v715_v5, 0.0  ;;  %v720_v10 = vsel %vm2388_vm13, %v716_v6, 0.0  ;;  %v733_v17 = vpop.permute.xlu0 %732  ;;  %vm767_vm13 = vcmp.eq.s32.totalorder %v2176_v30, 0 }
 0x281   : > { %v719_v9 = vadd.f32 %v718_v8, %v717_v7  ;;  %v785_v40 = vsel %vm767_vm13, 1, %v1882_v27 }
 0x282   : > { %v789_v46 = vrot.slane %v785_v40, %v2181_v33  ;;  %v793_v48 = vrot.slane %v785_v40, %v2184_v35  ;;  %v797_v61 = vrot.slane %v785_v40, %v2179_v32 }
 0x283   : > { %v721_v11 = vadd.f32 %v720_v10, %v719_v9 }
 0x284   : > { %vm2233_vm10 = vcmp.eq.s32.totalorder %v789_v46, 1  ;;  %vm799_vm13 = vcmp.eq.s32.totalorder %v793_v48, 1  ;;  %vm800_vm9 = vcmp.eq.s32.totalorder %v797_v61, 1 }
 0x285   : > { %722 = vadd.xlane.f32.xlu1 %v721_v11 }
 0x296   : > { %739 = vperm.xlu1 %1680, %v678_v58  }
 0x312   : > { %v723_v12 = vpop.xlane.xlu1 %722 }
 0x313   : > { %v724_v13 = vmul.f32 0.00390625, %v723_v12 }
 0x315   : > { %v725_v14 = vadd.f32 1e-05, %v724_v13 }
 0x316   : > { %v740_v21 = vpop.permute.xlu1 %739 }
 0x317   : > { %1708 = vrsqrt.f32 %v725_v14 }
 0x321   : > { %v1709_v15 = vpop.eup %1708 }
 0x322   : > { %v727_v18 = vmul.f32 %v1709_v15, %v708_v62  ;;  %v728_v19 = vmul.f32 %v1709_v15, %v709_v63  ;;  %v729_v20 = vmul.f32 %v1709_v15, %v710_v0  ;;  %v833_v63 = vrot.slane %v821_v42, %v2179_v32 }
 0x324   : > { %v735_v22 = vmul.f32 %v733_v17, %v727_v18  ;;  %v736_v23 = vmul.f32 %v733_v17, %v728_v19  ;;  %v737_v24 = vmul.f32 %v733_v17, %v729_v20 }
 0x326   : > { %v744_v25 = vadd.f32 %v740_v21, %v737_v24  ;;  %v742_v26 = vadd.f32 %v740_v21, %v735_v22  ;;  %v743_v28 = vadd.f32 %v740_v21, %v736_v23 }
 0x328   : > { %v747_v29 = vmax.f32 %v744_v25, 0.0  ;;  %v745_v31 = vmax.f32 %v742_v26, 0.0  ;;  %v746_v34 = vmax.f32 %v743_v28, 0.0 }
 0x32a   : > { %805 = vrot.lane.b32.xlu0 %v747_v29, %s1885_s15  ;;  %749 = vrot.lane.b32.xlu1 %v747_v29, %s1886_s23  ;;  %s1890_s15 = smov 18   ;;  %s1891_s23 = smov 54  }
 0x32e   : > { %810 = vrot.lane.b32.xlu0 %v746_v34, %s1887_s27  ;;  %754 = vrot.lane.b32.xlu1 %v745_v31, %s1888_s8 }
 0x332   : > { %780 = vrot.lane.b32.xlu0 %v745_v31, %s1889_s11  ;;  %756 = vrot.lane.b32.xlu1 %v746_v34, %s1888_s8 }
 0x336   : > { %768 = vrot.lane.b32.xlu1 %v745_v31, %s1874_s26 }
 0x33a   : > { %770 = vrot.lane.b32.xlu1 %v746_v34, %s1874_s26 }
 0x33e   : > { %772 = vrot.lane.b32.xlu1 %v747_v29, %s1874_s26 }
 0x342   : > { %808 = vrot.lane.b32.xlu1 %v745_v31, %s1887_s27 }
 0x346   : > { %758 = vrot.lane.b32.xlu1 %v747_v29, %s1888_s8 }
 0x34a   : > { %812 = vrot.lane.b32.xlu1 %v747_v29, %s1887_s27 }
 0x39c   : > { %v750_v36 = vpop.permute.xlu1 %749  ;;  %v806_v47 = vpop.permute.xlu0 %805 }
 0x3a0   : > { %v755_v37 = vpop.permute.xlu1 %754  ;;  %v811_v53 = vpop.permute.xlu0 %810 }
 0x3a1   : > { %v766_v54 = vsel %vm760_vm11, %v750_v36, %v755_v37 }
 0x3a4   : > { %v757_v38 = vpop.permute.xlu1 %756  ;;  %v781_v2 = vpop.permute.xlu0 %780 }
 0x3a5   : > { %v761_v33 = vsel %vm760_vm11, %v755_v37, %v757_v38 }
 0x3a8   : > { %v769_v39 = vpop.permute.xlu1 %768 }
 0x3ac   : > { %v771_v41 = vpop.permute.xlu1 %770 }
 0x3ad   : > { %v775_v30 = vsel %vm2394_vm6, %v769_v39, %v771_v41 }
 0x3ae   : > { %v801_v55 = vsel %vm2233_vm10, %v775_v30, %v766_v54  ;;  %vm836_vm10 = vcmp.eq.s32.totalorder %v833_v63, 1 }
 0x3b0   : > { %v773_v51 = vpop.permute.xlu1 %772 }
 0x3b1   : > { %v776_v27 = vsel %vm2394_vm6, %v771_v41, %v773_v51  ;;  %vm783_vm6 = vcmask 252928  }
 0x3b2   : > { %v802_v56 = vsel %vm799_vm13, %v776_v27, %v761_v33  ;;  %v784_v3 = vsel %vm783_vm6, %v773_v51, %v781_v2  ;;  %vm849_vm13 = vcmask 146432   ;;  %vm858_vm6 = vcmask 404480  }
 0x3b4   : > { %v809_v35 = vpop.permute.xlu1 %808 }
 0x3b5   : > { %v815_v57 = vsel %vm814_vm12, %v809_v35, %v811_v53  ;;  %v820_v58 = vsel %vm814_vm12, %v806_v47, %v809_v35 }
 0x3b6   : > { %v837_v59 = vsel %vm834_vm8, %v820_v58, %v801_v55  ;;  %v838_v60 = vsel %vm835_vm7, %v815_v57, %v802_v56  ;;  %vm854_vm7 = vcmask 1043600   ;;  %vm855_vm8 = vcmask 1047556  }
 0x3b7   : > { %v843_v62 = vcombine.low %v837_v59, %v838_v60 }
 0x3b8   : > { %v759_v0 = vpop.permute.xlu1 %758 }
 0x3b9   : > { %844 = vrot.lane.b32.xlu0 %v843_v62, %s1890_s15  ;;  %v762_v1 = vsel %vm760_vm11, %v757_v38, %v759_v0  ;;  %vm856_vm11 = vmor %vm855_vm8, %vm854_vm7  ;;  %vm2419_vm8 = vcmask 1039360  }
 0x3ba   : > { %v803_v6 = vsel %vm800_vm9, %v784_v3, %v762_v1  ;;  %vm869_vm9 = vcmask 441344  }
 0x3bc   : > { %v813_v4 = vpop.permute.xlu1 %812 }
 0x3bd   : > { %v816_v5 = vsel %vm814_vm12, %v811_v53, %v813_v4  ;;  %vm872_vm12 = vcmask 552336  }
 0x3be   : > { %v839_v7 = vsel %vm836_vm10, %v816_v5, %v803_v6  ;;  %vm874_vm10 = vcmask 568864  }
 0x3bf   : > { %846 = vrot.lane.b32.xlu0 %v839_v7, %s1890_s15  ;;  %v865_v8 = vcombine.low %v838_v60, %v839_v7 }
 0x3c1   : > { %866 = vrot.lane.b32.xlu1 %v865_v8, %s1891_s23 }
 0x3c5   : > { %860 = vrot.lane.b32.xlu1 %v837_v59, %s1877_s10 }
 0x42b   : > { %v845_v32 = vpop.permute.xlu0 %844 }
 0x42c   : > { %v848_v9 = vrot.slane %v845_v32, 4 }
 0x42e   : > { %v850_v10 = vsel %vm849_vm13, %v848_v9, %v845_v32 }
 0x42f   : > { %857 = vst.msk [vmem:[#allocation2] sm:$0xff] %vm856_vm11, %v850_v10  ;;  %vm2421_vm11 = vcmask 900096  }
 0x431   : > { %v847_v11 = vpop.permute.xlu0 %846 }
 0x432   : > { %v851_v12 = vsel %vm849_vm13, %v848_v9, %v847_v11 }
 0x433   : > { %859 = vst.msk [vmem:[#allocation2 + $0x8] sm:$0xf] %vm858_vm6, %v851_v12  ;;  %v867_v13 = vpop.permute.xlu1 %866 }
 0x434   : > { %v868_v14 = vrot.slane %v867_v13, 4 }
 0x436   : > { %v870_v15 = vsel %vm869_vm9, %v867_v13, %v868_v14  ;;  %vm2423_vm9 = vcmask 883712  }
 0x437   : > { %873 = vst.msk [vmem:[#allocation2 + $0x8] sm:$0xf] %vm872_vm12, %v870_v15  ;;  %v861_v17 = vpop.permute.xlu1 %860  ;;  %vm2424_vm12 = vcmask 744448  }
 0x438   : > { %875 = vst.msk [vmem:[#allocation2 + $0x8] sm:$0xf] %vm874_vm10, %v1876_v16  ;;  %vm2425_vm10 = vcmask 736256  }
 0x439   : > { %864 = vst.msk [vmem:[#allocation2] sm:$0xf] %vm863_vm2, %v861_v17  ;;  %vm2416_vm2 = vcmask 257026  }
 0x43a   : > { %vm2418_vm7 = vmmov %vm2416_vm2 }
 0x43b   : > { %vm2420_vm13 = vmmov %vm2416_vm2 }
 0x43c   : > { %vm2422_vm6 = vmmov %vm2416_vm2 }
 0x43f   : > { %v877_v18 = vld [vmem:[#allocation2 + $0x8] sm:$0xf] }
 0x440   : > { %v876_v19 = vld [vmem:[#allocation2] sm:$0xff]  ;;  %v927_v20 = vld [vmem:[#allocation2 + $0x8] sm:$0xf]  ;;  %v1542_v21 = vpack.c.bf16 %v877_v18, %v877_v18 }
 0x441   : > { %v879_v22 = vcombine.high %v876_v19, %v876_v19  ;;  %v1546_v23 = vpack.c.bf16 %v927_v20, %v927_v20  ;;  %v985_v24 = vld [vmem:[#allocation2 + $0x8] sm:$0xf] }
 0x442   : > { %895 = vst.msk [vmem:[#allocation4 + $0x8] sm:$0x3] %vm288_vm0, %v1542_v21  ;;  %v1550_v26 = vpack.c.bf16 %v985_v24, %v985_v24  ;;  %v1043_v28 = vld [vmem:[#allocation2 + $0x8] sm:$0xf] }
 0x443   : > { %v1541_v25 = vpack.c.bf16 %v879_v22, %v876_v19  ;;  %944 = vrot.lane.b32.xlu1 %v1546_v23, %s1873_s24  ;;  %v897_v29 = vld [vmem:[#allocation2 + $0x8] sm:$0xf]  ;;  %v1554_v31 = vpack.c.bf16 %v1043_v28, %v1043_v28 }
 0x444   : > { %v1544_v34 = vpack.c.bf16 %v897_v29, %v897_v29  ;;  %v955_v36 = vld [vmem:[#allocation2 + $0x8] sm:$0xf] }
 0x445   : > { %894 = vst [vmem:[#allocation4] sm:$0x33] %v1541_v25  ;;  %942 = vrot.lane.b32.xlu0 %v1541_v25, %s1873_s24  ;;  %v1548_v38 = vpack.c.bf16 %v955_v36, %v955_v36  ;;  %v1013_v39 = vld [vmem:[#allocation2 + $0x8] sm:$0xf]  ;;  %v912_v40 = vrot.slane %v1541_v25, 6 }
 0x446   : > { %v913_v37 = vrot.slane %v1544_v34, 6  ;;  %v1552_v42 = vpack.c.bf16 %v1013_v39, %v1013_v39  ;;  %v1071_v46 = vld [vmem:[#allocation2 + $0x8] sm:$0xf] }
 0x447   : > { %1002 = vrot.lane.b32.xlu1 %v1550_v26, %s1875_s9  ;;  %v971_v41 = vrot.slane %v1548_v38, 6  ;;  %v1556_v48 = vpack.c.bf16 %v1071_v46, %v1071_v46  ;;  %v1101_v50 = vld [vmem:[#allocation2 + $0x8] sm:$0xf] }
 0x448   : > { %v1029_v47 = vrot.slane %v1552_v42, 6  ;;  %v1558_v51 = vpack.c.bf16 %v1101_v50, %v1101_v50 }
 0x449   : > { %1000 = vrot.lane.b32.xlu0 %v1541_v25, %s1875_s9  ;;  %v1087_v49 = vrot.slane %v1556_v48, 6  ;;  %v1128_v48 = vld [vmem:[#allocation10] sm:$0x3] }
 0x44b   : > { %1060 = vrot.lane.b32.xlu1 %v1554_v31, %s1879_s13 }
 0x44d   : > { %1058 = vrot.lane.b32.xlu0 %v1541_v25, %s1879_s13 }
 0x44f   : > { %916 = vrot.lane.b32.xlu1 %v913_v37, %s1874_s26 }
 0x451   : > { %914 = vrot.lane.b32.xlu0 %v912_v40, %s1874_s26 }
 0x453   : > { %974 = vrot.lane.b32.xlu1 %v971_v41, %s1877_s10 }
 0x455   : > { %972 = vrot.lane.b32.xlu0 %v912_v40, %s1877_s10 }
 0x457   : > { %1032 = vrot.lane.b32.xlu1 %v1029_v47, %s1878_s12 }
 0x459   : > { %1030 = vrot.lane.b32.xlu0 %v912_v40, %s1878_s12 }
 0x45b   : > { %1090 = vrot.lane.b32.xlu1 %v1087_v49, %s1880_s29 }
 0x45d   : > { %1088 = vrot.lane.b32.xlu0 %v912_v40, %s1880_s29 }
 0x45f   : > { %1118 = vrot.lane.b32.xlu1 %v1558_v51, %s1881_s30 }
 0x461   : > { %1116 = vrot.lane.b32.xlu0 %v1541_v25, %s1881_s30  ;;  %s1894_s30 = smov [#allocation11]  }
 0x462   : > { %s1802_s27 = sshll.u32 %s1894_s30, 4  ;;  %s1803_s27 = int_to_ptr.vmem [resolvable:$false] %s1802_s27 }
 0x463   : > { %s1804_s8 = scalar_lea.vmem %s1803_s27, 384 }
 0x4b5   : > { %v945_v52 = vpop.permute.xlu1 %944 }
 0x4b6   : > { %v947_v30 = vrot.slane %v945_v52, 4  ;;  %953 = vst.msk [vmem:[#allocation4 + $0x14] sm:$0x3] %vm288_vm0, %v945_v52 }
 0x4b7   : > { %v943_v27 = vpop.permute.xlu0 %942 }
 0x4b8   : > { %v946_v53 = vrot.slane %v943_v27, 4 }
 0x4b9   : > { %v1003_v54 = vpop.permute.xlu1 %1002 }
 0x4ba   : > { %v948_v33 = vsel %vm314_vm3, %v946_v53, %v947_v30  ;;  %v1005_v35 = vrot.slane %v1003_v54, 4  ;;  %1011 = vst.msk [vmem:[#allocation4 + $0x20] sm:$0x3] %vm288_vm0, %v1003_v54  ;;  %v1892_v30 = vmov 3  }
 0x4bb   : > { %v949_v55 = vsel %vm346_vm5, %v943_v27, %v948_v33  ;;  %v1001_v56 = vpop.permute.xlu0 %1000  ;;  %vm2417_vm5 = vcmask 752640   ;;  %1682 = vset.pattern.permute.xlu1 %v1892_v30  ;;  %v1321_v27 = vld [vmem:[%s2096_s16] sm:$0xff]  ;;  %s1590_s16 = smul.u32 192, %s1946_s22  ;;  %s1348_s22 = scalar_lea.sflag [#allocation7], %s2090_s28 }
 0x4bc   : > { %952 = vst [vmem:[#allocation4 + $0xc] sm:$0x33] %v949_v55  ;;  %v1004_v57 = vrot.slane %v1001_v56, 4  ;;  %v1325_v53 = vcombine.high %v1321_v27, %v1321_v27 }
 0x4bd   : > { %v1061_v58 = vpop.permute.xlu1 %1060  ;;  %s2334_s29 = scalar_lea.hbm %s2383_s5, %s1590_s16 }
 0x4be   : > { %v1006_v59 = vsel %vm314_vm3, %v1004_v57, %v1005_v35  ;;  %v1063_v60 = vrot.slane %v1061_v58, 4  ;;  %1069 = vst.msk [vmem:[#allocation4 + $0x2c] sm:$0x3] %vm288_vm0, %v1061_v58 }
 0x4bf   : > { %v1007_v61 = vsel %vm406_vm4, %v1001_v56, %v1006_v59  ;;  %v1059_v62 = vpop.permute.xlu0 %1058 }
 0x4c0   : > { %1010 = vst [vmem:[#allocation4 + $0x18] sm:$0x33] %v1007_v61  ;;  %v1062_v63 = vrot.slane %v1059_v62, 4 }
 0x4c1   : > { %v917_v0 = vpop.permute.xlu1 %916 }
 0x4c2   : > { %v1064_v1 = vsel %vm314_vm3, %v1062_v63, %v1063_v60  ;;  %v919_v2 = vrot.slane %v917_v0, 4  ;;  %925 = vst.msk [vmem:[#allocation4 + $0x8] sm:$0xc] %vm2416_vm2, %v917_v0  ;;  %vm2427_vm2 = vcmask 293888  }
 0x4c3   : > { %v1065_v3 = vsel %vm2417_vm5, %v1059_v62, %v1064_v1  ;;  %v915_v4 = vpop.permute.xlu0 %914 }
 0x4c4   : > { %1068 = vst [vmem:[#allocation4 + $0x24] sm:$0x33] %v1065_v3  ;;  %v918_v5 = vrot.slane %v915_v4, 4 }
 0x4c5   : > { %v975_v6 = vpop.permute.xlu1 %974 }
 0x4c6   : > { %v920_v7 = vsel %vm314_vm3, %v918_v5, %v919_v2  ;;  %v977_v8 = vrot.slane %v975_v6, 4  ;;  %983 = vst.msk [vmem:[#allocation4 + $0x14] sm:$0xc] %vm2418_vm7, %v975_v6 }
 0x4c7   : > { %v921_v32 = vsel %vm2419_vm8, %v915_v4, %v920_v7  ;;  %v973_v9 = vpop.permute.xlu0 %972  ;;  %vm2430_vm8 = vmmov %vm2427_vm2  ;;  %v1893_v4 = vmov 2  }
 0x4c8   : > { %924 = vst [vmem:[#allocation4] sm:$0xcc] %v921_v32  ;;  %v976_v10 = vrot.slane %v973_v9, 4  ;;  %1681 = vset.pattern.permute.xlu0 %v1893_v4 }
 0x4c9   : > { %v1033_v11 = vpop.permute.xlu1 %1032 }
 0x4ca   : > { %v978_v12 = vsel %vm314_vm3, %v976_v10, %v977_v8  ;;  %v1035_v13 = vrot.slane %v1033_v11, 4  ;;  %1041 = vst.msk [vmem:[#allocation4 + $0x20] sm:$0xc] %vm2420_vm13, %v1033_v11  ;;  %vm2431_vm13 = vcmask 257024  }
 0x4cb   : > { %v979_v14 = vsel %vm2421_vm11, %v973_v9, %v978_v12  ;;  %v1031_v15 = vpop.permute.xlu0 %1030  ;;  %vm2432_vm11 = vmmov %vm2431_vm13 }
 0x4cc   : > { %982 = vst [vmem:[#allocation4 + $0xc] sm:$0xcc] %v979_v14  ;;  %v1034_v17 = vrot.slane %v1031_v15, 4 }
 0x4cd   : > { %v1091_v18 = vpop.permute.xlu1 %1090  ;;  %v1696_v19 = vld [vmem:[#allocation4 + $0x8] ss:$12 sps:$4 sm:$0xff]  }
 0x4ce   : > { %v1036_v20 = vsel %vm314_vm3, %v1034_v17, %v1035_v13  ;;  %v1093_v21 = vrot.slane %v1091_v18, 4  ;;  %1099 = vst.msk [vmem:[#allocation4 + $0x2c] sm:$0xc] %vm2422_vm6, %v1091_v18  ;;  %1578 = vmatpush3.bf16.msra.mxu1 %v1696_v19 }
 0x4cf   : > { %v1037_v22 = vsel %vm2423_vm9, %v1031_v15, %v1036_v20  ;;  %v1089_v23 = vpop.permute.xlu0 %1088  ;;  %1579 = vmatprep.subr.bf16.mxu1 %v1876_v16 }
 0x4d0   : > { %1040 = vst [vmem:[#allocation4 + $0x18] sm:$0xcc] %v1037_v22  ;;  %v1092_v24 = vrot.slane %v1089_v23, 4 }
 0x4d1   : > { %v1119_v25 = vpop.permute.xlu1 %1118 }
 0x4d2   : > { %v1094_v26 = vsel %vm314_vm3, %v1092_v24, %v1093_v21  ;;  %v1121_v28 = vrot.slane %v1119_v25, 4  ;;  %1127 = vst.msk [vmem:[#allocation4 + $0x38] sm:$0x3] %vm288_vm0, %v1119_v25  ;;  %vm2426_vm0 = vcmask 1041408  }
 0x4d3   : > { %v1095_v29 = vsel %vm2424_vm12, %v1089_v23, %v1094_v26  ;;  %v1117_v31 = vpop.permute.xlu0 %1116  ;;  %v1697_v34 = vld [vmem:[#allocation4] ss:$12 sps:$4 sm:$0xff]   ;;  %v1699_v36 = vld [vmem:[#allocation4 + $0x4] ss:$12 sps:$4 sm:$0xff]   ;;  %vm2428_vm5 = vmmov %vm2426_vm0 }
 0x4d4   : > { %1098 = vst [vmem:[#allocation4 + $0x24] sm:$0xcc] %v1095_v29  ;;  %v1120_v37 = vrot.slane %v1117_v31, 4  ;;  %1191 = vmatprep.subr.bf16.mxu0 %v1699_v36  ;;  %vm2429_vm7 = vmmov %vm2426_vm0 }
 0x4d5   : > { %v1700_v38 = vld [vmem:[#allocation4 + $0x20] ss:$12 sps:$4 sm:$0xff]   ;;  %1192 = vmatpush1.bf16.msra.mxu0 %v1697_v34 }
 0x4d6   : > { %v1122_v39 = vsel %vm314_vm3, %v1120_v37, %v1121_v28  ;;  %1580 = vmatpush3.bf16.msra.mxu1 %v1700_v38 }
 0x4d7   : > { %v1123_v40 = vsel %vm2425_vm10, %v1117_v31, %v1122_v39  ;;  %1581 = vmatprep.subr.bf16.mxu1 %v1876_v16  ;;  %v1272_v16 = vld [vmem:[%s2381_s3] sm:$0xf] }
 0x4d8   : > { %1126 = vst [vmem:[#allocation4 + $0x30] sm:$0x33] %v1123_v40  ;;  %1315 = vperm.xlu1 %1682, %v1272_v16  }
 0x4d9   : > { %v1704_v41 = vld [vmem:[#allocation4 + $0x38] ss:$0 sps:$4 sm:$0x33]  }
 0x4da   : > { %v1189_v47 = vsel %vm2426_vm0, %v1704_v41, 0 }
 0x4db   : > { %v1701_v42 = vld [vmem:[#allocation4 + $0x18] ss:$12 sps:$4 sm:$0xff]   ;;  %v1703_v46 = vld [vmem:[#allocation4 + $0x1c] ss:$12 sps:$4 sm:$0xff]   ;;  %1582 = vmatpush3.bf16.msra.mxu1 %v1189_v47 }
 0x4dc   : > { %1193 = vmatprep.subr.bf16.mxu0 %v1703_v46  ;;  %1326 = vrot.lane.b32.xlu1 %v1321_v27, %s1875_s9 }
 0x4dd   : > { %1194 = vmatpush1.bf16.msra.mxu0 %v1701_v42 }
 0x4de   : > { %1584 = vmatmul.mubr.msk.bf16.vlgmr.msra.gmra.mrb[4].mxu1 %vm2427_vm2, %v1128_v48 }
 0x4df   : > { %v1137_v49 = vld [vmem:[#allocation4 + $0x30] sm:$0x33] }
 0x4e0   : > { %v1515_v50 = vcombine.high %v1137_v49, %v1137_v49  ;;  %v1514_v51 = vcombine.low %v1137_v49, %v1137_v49  ;;  %1328 = vrot.lane.b32.xlu1 %v1325_v53, %s1875_s9 }
 0x4e2   : > { %1517 = vmatprep.subr.msk.bf16.mxu0 %vm2428_vm5, %v1515_v50  ;;  %v1183_v52 = vsel %vm2429_vm7, %v1514_v51, 0 }
 0x4e3   : > { %1196 = vmatpush1.bf16.msra.mxu0 %v1183_v52 }
 0x4e6   : > { %1518 = vmatmul.mubr.msk.bf16.vlgmr.msra.gmra.mrb[4].mxu0 %vm2430_vm8, %v1128_v48 }
 0x557   : > { %v1316_v45 = vpop.permute.xlu1 %1315 }
 0x55b   : > { %v1327_v21 = vpop.permute.xlu1 %1326 }
 0x55f   : > { %v1329_v22 = vpop.permute.xlu1 %1328 }
 0x560   : > { %v1333_v42 = vsel %vm406_vm4, %v1327_v21, %v1329_v22 }
 0x5b1   : > { %v1266_v54 = vpop.f32.mrb[4].mxu1 }
 0x5b2   : > { %v1585_v33 = vpop.f32.mrb[5].mxu1  ;;  %v1275_v57 = vsel %vm2189_vm15, %v1266_v54, 0.0 }
 0x5b3   : > { %v1269_v35 = vpop.f32.mrb[6].mxu1  ;;  %v1279_v1 = vsel %vm2431_vm13, %v1275_v57, 0.0 }
 0x5b4   : > { %v1586_v55 = vpop.f32.mrb[7].mxu1 }
 0x5b9   : > { %v1225_v56 = vpop.f32.mrb[4].mxu0 }
 0x5ba   : > { %v1273_v58 = vsel %vm2193_vm1, %v1225_v56, 0.0  ;;  %v1227_v59 = vpop.f32.mrb[5].mxu0 }
 0x5bb   : > { %v1276_v60 = vsel %vm314_vm3, %v1273_v58, 0.0  ;;  %v1274_v61 = vsel %vm2197_vm14, %v1227_v59, 0.0  ;;  %v1229_v62 = vpop.f32.mrb[6].mxu0 }
 0x5bc   : > { %v1277_v63 = vsel %vm314_vm3, %v1274_v61, 0.0  ;;  %v1230_v0 = vpop.f32.mrb[7].mxu0 }
 0x5bd   : > { %v1278_v2 = vadd.f32 %v1277_v63, %v1276_v60 }
 0x5bf   : > { %v1280_v3 = vadd.f32 %v1279_v1, %v1278_v2 }
 0x5c1   : > { %1281 = vadd.xlane.f32.xlu0 %v1280_v3 }
 0x5d7   : > { %1308 = vperm.xlu0 %1681, %v1272_v16  }
 0x5db   : > { %1683 = vset.pattern.permute.xlu0 %v1892_v30 }
 0x64e   : > { %v1282_v5 = vpop.xlane.xlu0 %1281 }
 0x64f   : > { %v1283_v6 = vmul.f32 0.00390625, %v1282_v5 }
 0x651   : > { %v1284_v7 = vsub.f32 %v1225_v56, %v1283_v6  ;;  %v1285_v8 = vsub.f32 %v1227_v59, %v1283_v6  ;;  %v1286_v32 = vsub.f32 %v1266_v54, %v1283_v6 }
 0x653   : > { %v1287_v9 = vsel %vm2193_vm1, %v1284_v7, 0.0  ;;  %v1288_v10 = vsel %vm2197_vm14, %v1285_v8, 0.0  ;;  %v1289_v11 = vsel %vm2189_vm15, %v1286_v32, 0.0 }
 0x654   : > { %v1290_v12 = vmul.f32 %v1287_v9, %v1287_v9  ;;  %v1291_v13 = vmul.f32 %v1288_v10, %v1288_v10  ;;  %v1292_v14 = vmul.f32 %v1289_v11, %v1289_v11 }
 0x656   : > { %v1293_v15 = vsel %vm314_vm3, %v1290_v12, 0.0  ;;  %v1294_v17 = vsel %vm314_vm3, %v1291_v13, 0.0  ;;  %v1296_v19 = vsel %vm2432_vm11, %v1292_v14, 0.0  ;;  %v1309_v26 = vpop.permute.xlu0 %1308  ;;  %vm2433_vm3 = vmmov %vm2432_vm11 }
 0x657   : > { %v1295_v18 = vadd.f32 %v1294_v17, %v1293_v15 }
 0x659   : > { %v1297_v20 = vadd.f32 %v1296_v19, %v1295_v18 }
 0x65b   : > { %1298 = vadd.xlane.f32.xlu1 %v1297_v20 }
 0x66c   : > { %1330 = vrot.lane.b32.xlu1 %v1322_v44, %s1875_s9  ;;  %s265_s9 = scalar_lea.vmem [#allocation11], %s1589_s14 }
 0x66d   : > { %s1362_s10 = sshll.u32 %s265_s9, 4  ;;  %s2336_s10 = int_to_ptr.vmem [resolvable:$true] %s1362_s10 }
 0x66e   : > { %s1798_s14 = scalar_lea.vmem %s2336_s10, 192  ;;  %p1805_p8 = scmp.lt.s32.totalorder %s2336_s10, %s1803_s27 }
 0x66f   : > { %p1799_p2 = scmp.ne.s32.totalorder %s2336_s10, %s1798_s14  ;;  %p1806_p11 = scmp.lt.s32.totalorder %s1804_s8, %s1798_s14 }
 0x671   : > { %p1800_p1 = pnand %p1799_p2, %p2044_p6  ;;  %p1807_p3 = por %p1806_p11, %p1805_p8 }
 0x673   : > { %p1801_p4 = pneg %p1800_p1 }
 0x675   : > { %p1808_p7 = pnand %p1807_p3, %p1801_p4 }
 0x6e8   : > { %v1299_v43 = vpop.xlane.xlu1 %1298 }
 0x6e9   : > { %v1300_v23 = vmul.f32 0.00390625, %v1299_v43 }
 0x6eb   : > { %v1301_v24 = vadd.f32 1e-05, %v1300_v23 }
 0x6ec   : > { %v1331_v34 = vpop.permute.xlu1 %1330 }
 0x6ed   : > { %1710 = vrsqrt.f32 %v1301_v24  ;;  %v1334_v46 = vsel %vm406_vm4, %v1329_v22, %v1331_v34 }
 0x6f7   : > { %v1711_v25 = vpop.eup %1710 }
 0x6f8   : > { %v1303_v28 = vmul.f32 %v1711_v25, %v1284_v7  ;;  %v1304_v29 = vmul.f32 %v1711_v25, %v1285_v8  ;;  %v1305_v31 = vmul.f32 %v1711_v25, %v1286_v32 }
 0x6fa   : > { %v1311_v36 = vmul.f32 %v1309_v26, %v1303_v28  ;;  %v1312_v37 = vmul.f32 %v1309_v26, %v1304_v29  ;;  %v1313_v38 = vmul.f32 %v1309_v26, %v1305_v31 }
 0x6fc   : > { %v1318_v39 = vadd.f32 %v1316_v45, %v1311_v36  ;;  %v1319_v40 = vadd.f32 %v1316_v45, %v1312_v37  ;;  %v1320_v41 = vadd.f32 %v1316_v45, %v1313_v38 }
 0x6fe   : > { %v1338_v47 = vadd.f32 %v1333_v42, %v1318_v39  ;;  %v1339_v48 = vadd.f32 %v1334_v46, %v1319_v40  ;;  %v1340_v49 = vadd.f32 %v1331_v34, %v1320_v41 }
 0x700   : > { %v1343_v50 = vcombine.low %v1338_v47, %v1339_v48  ;;  %1346 = vst.msk [vmem:[%s265_s9 + $0x8] sm:$0xf] %vm2433_vm3, %v1340_v49 }
 0x702   : > { %1345 = vst [vmem:[%s265_s9] sm:$0xff] %v1343_v50 }
 0x703   : > { %1811 = shalt.err (!%p1808_p7)
}
 0x704   : > { %s1812_s28 = scalar_lea.hbm %s2334_s29, 192  ;;  %s1816_s23 = scalar_lea.hbm %s2383_s5, 384 }
 0x705   : > { %p1813_p10 = scmp.ne.s32.totalorder %s2334_s29, %s1812_s28  ;;  %p1817_p0 = scmp.lt.u32.totalorder %s2334_s29, %s2383_s5 }
 0x706   : > { %p1818_p12 = scmp.lt.u32.totalorder %s1816_s23, %s1812_s28  ;;  %p1820_p2 = scmp.lt.u32.totalorder %s1812_s28, %s2334_s29 }
 0x707   : > { %p1814_p13 = pnand %p1813_p10, %p2044_p6 }
 0x708   : > { %p1819_p9 = por %p1818_p12, %p1817_p0 }
 0x709   : > { %p1815_p5 = pneg %p1814_p13 }
 0x70a   : > { %p1821_p1 = por %p1820_p2, %p1819_p9 }
 0x70c   : > { %p1822_p4 = pnand %p1821_p1, %p1815_p5 }
 0x70e   : > { %1825 = shalt.err (!%p1822_p4)
}
 0x70f   : > { %1601 = dma.vmem_to_hbm [thread:$0]  (%p2044_p6), %s2336_s10, 192, %s2334_s29, %s1348_s22  }
 0x710 PF: > { %s1374_s16 = sand.u32 1, %s1856_s18   ;;  %p2434_p8 = scmp.ne.s32.totalorder %s2398_s25, 0 }
 0x711   : > { %p2435_p11 = scmp.ge.s32.totalorder %s1868_s21, 2  ;;  %s1375_s9 = scalar_lea.sflag [#allocation7], %s1374_s16 }
 0x713   : > { %p1615_p3 = pnand %p2435_p11, %p2434_p8 }
 0x715   : > { %1851 = dma.done.wait (!%p1615_p3), %s1375_s9, 192  }
 0x716   : > { %1853 = vsyncadd (!%p1615_p3), %s1375_s9, 4294967104  ;;  %p19_p7 = scmp.ge.s32.totalorder %s1981_s7, 4   ;;  %s2436_s18 = smov %s1860_s19 }
 0x717   : > { %s2437_s19 = smov %s1864_s20  ;;  %s2438_s20 = smov %s2040_s6 }
 0x718   : > { %s2439_s21 = smov %s1981_s7  ;;  %21 = sbr.rel (!%p19_p7) target bundleno = 6 (0x6), region = 93 }
 0x71f   :  { %1380 = vsyncpa [#allocation6], 1 }
 0x720   :  { %1382 = vsyncpa [#allocation6 + $0x1], 1 }
 0x721   :  { %1383 = vsyncpa [#allocation9], 1 }
 0x722   :  { %1384 = vsyncpa [#allocation7], 1 }
 0x723   :  { %1386 = vsyncpa [#allocation7 + $0x1], 1 }

</bundles_post_ra>
